<compile_context>
chip_gen: v6e
topology: v6e:2x2x1
jax: 0.10.0
libtpu: 0.0.40
codegen_flags: <defaults>
</compile_context>

<pallas_src>
import functools

import jax
import jax.numpy as jnp
import numpy as np
from jax.experimental import pallas as pl
from jax.experimental.pallas import tpu as pltpu

BN_EPS = 1e-5  # PyTorch BatchNorm1d default eps


# --------------------------------------------------------------------------------------
# Pallas kernel: one AttentionalPropagation layer (attn + MLP + residual) per
# (batch item, query tile) grid step.
# --------------------------------------------------------------------------------------
def attn_prop_kernel(x_ref, s_ref,
                     wq_ref, bq_ref, wk_ref, wv_ref, bv_ref,
                     wm_ref, bm_ref,
                     w1a_ref, w1b_ref, b1_ref,
                     w2_ref, b2_ref,
                     out_ref, *, num_heads):
    x = x_ref[0]          # (tq, F) f32 query rows
    s = s_ref[0]          # (N,  F) f32 full source rows
    feat = x.shape[-1]
    dim = feat // num_heads
    scale = 1.0 / (float(dim) ** 0.5)

    x_bf = x.astype(jnp.bfloat16)
    s_bf = s.astype(jnp.bfloat16)

    # query / key / value projections (1x1 convs -> matmuls); head channels contiguous.
    # Key bias is omitted: q . (k_m + bk) adds a term constant in m, cancelled by softmax.
    q = jnp.dot(x_bf, wq_ref[...], preferred_element_type=jnp.float32) + bq_ref[0]
    k = jnp.dot(s_bf, wk_ref[...], preferred_element_type=jnp.float32)
    v = jnp.dot(s_bf, wv_ref[...], preferred_element_type=jnp.float32) + bv_ref[0]

    q_bf = q.astype(jnp.bfloat16)
    k_bf = k.astype(jnp.bfloat16)
    v_bf = v.astype(jnp.bfloat16)

    # Accumulated merge: merged = sum_h softmax(q_h k_h^T / sqrt(d)) v_h @ wm[h]  + bm
    merged = jnp.zeros((x.shape[0], feat), jnp.float32)
    for h in range(num_heads):
        sl = slice(h * dim, (h + 1) * dim)
        sc = jax.lax.dot_general(q_bf[:, sl], k_bf[:, sl],
                                 (((1,), (1,)), ((), ())),
                                 preferred_element_type=jnp.float32) * scale   # (tq, N)
        sc = sc - jnp.max(sc, axis=-1, keepdims=True)
        e = jnp.exp(sc)
        l = jnp.sum(e, axis=-1, keepdims=True)                                 # (tq, 1)
        o = jnp.dot(e.astype(jnp.bfloat16), v_bf[:, sl],
                    preferred_element_type=jnp.float32)                        # (tq, d)
        # normalize the (tq, d) head output instead of the (tq, N) prob matrix
        o = o * pl.reciprocal(l, approx=True)
        merged = merged + jnp.dot(o.astype(jnp.bfloat16), wm_ref[h],
                                  preferred_element_type=jnp.float32)          # (tq, F)
    merged = merged + bm_ref[0]

    # MLP([2F, 2F, F]) on concat([x, message]) with the concat split into two matmuls.
    # BatchNorm (eval mode) is pre-folded into w1a/w1b/b1 on the host.
    h1 = (jnp.dot(x_bf, w1a_ref[...], preferred_element_type=jnp.float32)
          + jnp.dot(merged.astype(jnp.bfloat16), w1b_ref[...],
                    preferred_element_type=jnp.float32)
          + b1_ref[0])
    h1 = jnp.maximum(h1, 0.0)                                                  # ReLU
    delta = jnp.dot(h1.astype(jnp.bfloat16), w2_ref[...],
                    preferred_element_type=jnp.float32) + b2_ref[0]

    out_ref[0] = x + delta   # residual update (desc + delta) stays in f32


def _pick_query_tile(N):
    if N <= 512:
        return N
    for t in (512, 384, 256, 128):
        if N % t == 0:
            return t
    return N  # TODO(synk): pad N for ragged query tiling


def attn_prop_pallas(d_all, kp, num_heads, cross):
    """d_all: (2B, N, F) f32 persistent descriptor array.  Returns d_all + layer(d_all)."""
    B2, N, F = d_all.shape
    B = B2 // 2
    tq = _pick_query_tile(N)
    n_q = N // tq

    param_arrays = [kp['wq'], kp['bq'], kp['wk'], kp['wv'], kp['bv'],
                    kp['wm'], kp['bm'], kp['w1a'], kp['w1b'], kp['b1'],
                    kp['w2'], kp['b2']]

    def const_spec(a):
        nd = a.ndim
        return pl.BlockSpec(a.shape, lambda b, qi, _n=nd: (0,) * _n)

    if cross:
        # static swap of the two halves of the batch axis: no HBM concat copies needed.
        src_map = lambda b, qi: ((b + B) % B2, 0, 0)
    else:
        src_map = lambda b, qi: (b, 0, 0)

    in_specs = ([pl.BlockSpec((1, tq, F), lambda b, qi: (b, qi, 0)),   # query rows
                 pl.BlockSpec((1, N, F), src_map)]                     # full source rows
                + [const_spec(a) for a in param_arrays])

    return pl.pallas_call(
        functools.partial(attn_prop_kernel, num_heads=num_heads),
        out_shape=jax.ShapeDtypeStruct((B2, N, F), jnp.float32),
        grid=(B2, n_q),
        in_specs=in_specs,
        out_specs=pl.BlockSpec((1, tq, F), lambda b, qi: (b, qi, 0)),
        compiler_params=pltpu.CompilerParams(
            dimension_semantics=("parallel", "parallel")),
    )(d_all, d_all, *param_arrays)


# --------------------------------------------------------------------------------------
# Parameter construction (deterministic, PyTorch shape conventions) + kernel reshuffle.
# --------------------------------------------------------------------------------------
def init_layer_params(key, F):
    ks = jax.random.split(key, 16)

    def w(k, shape, scale=0.1):
        return scale * jax.random.normal(k, shape, jnp.float32)

    return dict(
        Wq=w(ks[0], (F, F)), bq=w(ks[1], (F,)),
        Wk=w(ks[2], (F, F)), bk=w(ks[3], (F,)),
        Wv=w(ks[4], (F, F)), bv=w(ks[5], (F,)),
        Wm=w(ks[6], (F, F)), bm=w(ks[7], (F,)),
        W1=w(ks[8], (2 * F, 2 * F)), b1=w(ks[9], (2 * F,)),
        gamma=1.0 + w(ks[10], (2 * F,)), beta=w(ks[11], (2 * F,)),
        mean=w(ks[12], (2 * F,)), var=0.5 + jnp.abs(w(ks[13], (2 * F,))),
        W2=w(ks[14], (F, 2 * F)),
        b2=jnp.zeros((F,), jnp.float32),   # nn.init.constant_(mlp[-1].bias, 0.0)
    )


def to_kernel_params(p, F, H):
    """Pre-transpose weights, permute head channels, fold BN, split concat, cast to bf16."""
    dim = F // H
    # new channel c' = h*dim + d  <-  PyTorch channel c = d*H + h
    perm = np.array([(c % dim) * H + (c // dim) for c in range(F)])
    bf = jnp.bfloat16

    # fold eval-mode BatchNorm into the first MLP layer: y = (cat@W1^T)*s + (b1-mu)*s + beta
    s_bn = p['gamma'] / jnp.sqrt(p['var'] + BN_EPS)              # (2F,)
    w1 = p['W1'].T * s_bn[None, :]                               # (2F_in, 2F_out), scaled cols
    b1 = (p['b1'] - p['mean']) * s_bn + p['beta']

    return dict(
        wq=p['Wq'][perm, :].T.astype(bf), bq=p['bq'][perm].reshape(1, F),
        wk=p['Wk'][perm, :].T.astype(bf),                        # key bias dropped (inert)
        wv=p['Wv'][perm, :].T.astype(bf), bv=p['bv'][perm].reshape(1, F),
        # merge weight as (H, dim, F): leading-axis indexing in-kernel, no sublane slicing
        wm=p['Wm'][:, perm].T.reshape(H, dim, F).astype(bf), bm=p['bm'].reshape(1, F),
        w1a=w1[:F, :].astype(bf),                                # acts on x
        w1b=w1[F:, :].astype(bf),                                # acts on message
        b1=b1.reshape(1, 2 * F),
        w2=p['W2'].T.astype(bf), b2=p['b2'].reshape(1, F),
    )


def attentional_gnn_pallas(desc0, desc1, layer_params, names, num_heads=4):
    """desc0, desc1: (B, F, N) (PyTorch Conv1d layout). Returns updated (desc0, desc1)."""
    B = desc0.shape[0]
    # single boundary transpose/concat; descriptors stay as one (2B, N, F) array after that.
    d_all = jnp.concatenate([jnp.transpose(desc0, (0, 2, 1)),
                             jnp.transpose(desc1, (0, 2, 1))], axis=0)
    for p, name in zip(layer_params, names):
        d_all = attn_prop_pallas(d_all, p['kernel'], num_heads, cross=(name == 'cross'))
    return (jnp.transpose(d_all[:B], (0, 2, 1)),
            jnp.transpose(d_all[B:], (0, 2, 1)))


# --------------------------------------------------------------------------------------
# Pure-JAX reference in the original PyTorch (B, F, N) convention, for verification.
# --------------------------------------------------------------------------------------
def _ref_conv1(x, W, b):
    return jnp.einsum('oi,bin->bon', W, x) + b[None, :, None]


def _ref_layer(x, src, p, H):
    q = _ref_conv1(x, p['Wq'], p['bq'])
    k = _ref_conv1(src, p['Wk'], p['bk'])
    v = _ref_conv1(src, p['Wv'], p['bv'])
    B, F, N = x.shape
    dim = F // H
    qh, kh, vh = (t.reshape(B, dim, H, N) for t in (q, k, v))
    scores = jnp.einsum('bdhn,bdhm->bhnm', qh, kh) / (float(dim) ** 0.5)
    prob = jax.nn.softmax(scores, axis=-1)
    msg = jnp.einsum('bhnm,bdhm->bdhn', prob, vh).reshape(B, F, N)
    merged = _ref_conv1(msg, p['Wm'], p['bm'])
    cat = jnp.concatenate([x, merged], axis=1)
    h1 = _ref_conv1(cat, p['W1'], p['b1'])
    h1 = (p['gamma'][None, :, None] * (h1 - p['mean'][None, :, None])
          / jnp.sqrt(p['var'][None, :, None] + BN_EPS) + p['beta'][None, :, None])
    h1 = jnp.maximum(h1, 0.0)
    delta = _ref_conv1(h1, p['W2'], p['b2'])
    return x + delta


def _ref_gnn(desc0, desc1, layer_params, names, H=4):
    for p, name in zip(layer_params, names):
        rp = p['raw']
        if name == 'cross':
            s0, s1 = desc1, desc0
        else:
            s0, s1 = desc0, desc1
        n0, n1 = _ref_layer(desc0, s0, rp, H), _ref_layer(desc1, s1, rp, H)
        desc0, desc1 = n0, n1
    return desc0, desc1


# --------------------------------------------------------------------------------------
if __name__ == "__main__":
    B, F, N = 2, 32, 16          # batch, feature_dim, num keypoints
    H = 4                        # AttentionalGNN hard-codes num_heads=4
    names = ['self', 'cross']

    key = jax.random.PRNGKey(0)
    k0, k1, *lkeys = jax.random.split(key, 2 + len(names))
    desc0 = jax.random.normal(k0, (B, F, N), jnp.float32)
    desc1 = jax.random.normal(k1, (B, F, N), jnp.float32)

    layer_params = []
    for lk in lkeys:
        raw = init_layer_params(lk, F)
        layer_params.append({'raw': raw, 'kernel': to_kernel_params(raw, F, H)})

    out0, out1 = attentional_gnn_pallas(desc0, desc1, layer_params, names, H)
    jax.block_until_ready((out0, out1))

    ref0, ref1 = _ref_gnn(desc0, desc1, layer_params, names, H)
    # bf16 MXU inputs (f32 accumulation) over two stacked layers -> looser tolerance
    # than the pure-f32 reference.
    np.testing.assert_allclose(np.asarray(out0), np.asarray(ref0), rtol=1e-1, atol=1e-1)
    np.testing.assert_allclose(np.asarray(out1), np.asarray(ref1), rtol=1e-1, atol=1e-1)

    print("KERNEL_OK")
</pallas_src>

<mosaic_0001>
module attributes {stable_mosaic.version = 11 : i64} {
  func.func @attn_prop_kernel(%arg0: i32, %arg1: i32, %arg2: memref<1x16x32xf32, #tpu.memory_space<vmem>>, %arg3: memref<1x16x32xf32, #tpu.memory_space<vmem>>, %arg4: memref<32x32xbf16, #tpu.memory_space<vmem>>, %arg5: memref<1x32xf32, #tpu.memory_space<vmem>>, %arg6: memref<32x32xbf16, #tpu.memory_space<vmem>>, %arg7: memref<32x32xbf16, #tpu.memory_space<vmem>>, %arg8: memref<1x32xf32, #tpu.memory_space<vmem>>, %arg9: memref<4x8x32xbf16, #tpu.memory_space<vmem>>, %arg10: memref<1x32xf32, #tpu.memory_space<vmem>>, %arg11: memref<32x64xbf16, #tpu.memory_space<vmem>>, %arg12: memref<32x64xbf16, #tpu.memory_space<vmem>>, %arg13: memref<1x64xf32, #tpu.memory_space<vmem>>, %arg14: memref<64x32xbf16, #tpu.memory_space<vmem>>, %arg15: memref<1x32xf32, #tpu.memory_space<vmem>>, %arg16: memref<1x16x32xf32, #tpu.memory_space<vmem>>) attributes {dimension_semantics = [#tpu.dimension_semantics<parallel>, #tpu.dimension_semantics<parallel>], iteration_bounds = array<i64: 4, 1>, scalar_prefetch = 0 : i64, scratch_operands = 0 : i64, tpu.core_type = #tpu.core_type<tc>, window_params = [{transform_indices = @transform_0, window_bounds = array<i64: 1, 16, 32>}, {transform_indices = @transform_1, window_bounds = array<i64: 1, 16, 32>}, {pipeline_mode = #tpu.pipeline_mode<synchronous>, transform_indices = @transform_2, window_bounds = array<i64: 32, 32>}, {pipeline_mode = #tpu.pipeline_mode<synchronous>, transform_indices = @transform_3, window_bounds = array<i64: 1, 32>}, {pipeline_mode = #tpu.pipeline_mode<synchronous>, transform_indices = @transform_4, window_bounds = array<i64: 32, 32>}, {pipeline_mode = #tpu.pipeline_mode<synchronous>, transform_indices = @transform_5, window_bounds = array<i64: 32, 32>}, {pipeline_mode = #tpu.pipeline_mode<synchronous>, transform_indices = @transform_6, window_bounds = array<i64: 1, 32>}, {pipeline_mode = #tpu.pipeline_mode<synchronous>, transform_indices = @transform_7, window_bounds = array<i64: 4, 8, 32>}, {pipeline_mode = #tpu.pipeline_mode<synchronous>, transform_indices = @transform_8, window_bounds = array<i64: 1, 32>}, {pipeline_mode = #tpu.pipeline_mode<synchronous>, transform_indices = @transform_9, window_bounds = array<i64: 32, 64>}, {pipeline_mode = #tpu.pipeline_mode<synchronous>, transform_indices = @transform_10, window_bounds = array<i64: 32, 64>}, {pipeline_mode = #tpu.pipeline_mode<synchronous>, transform_indices = @transform_11, window_bounds = array<i64: 1, 64>}, {pipeline_mode = #tpu.pipeline_mode<synchronous>, transform_indices = @transform_12, window_bounds = array<i64: 64, 32>}, {pipeline_mode = #tpu.pipeline_mode<synchronous>, transform_indices = @transform_13, window_bounds = array<i64: 1, 32>}, {transform_indices = @transform_14, window_bounds = array<i64: 1, 16, 32>}]} {
    %c0 = arith.constant 0 : index
    %c0_0 = arith.constant 0 : index
    %c0_1 = arith.constant 0 : index
    %0 = vector.load %arg2[%c0, %c0_0, %c0_1] : memref<1x16x32xf32, #tpu.memory_space<vmem>>, vector<1x16x32xf32>
    %1 = vector.shape_cast %0 : vector<1x16x32xf32> to vector<16x32xf32>
    %c0_2 = arith.constant 0 : index
    %c0_3 = arith.constant 0 : index
    %c0_4 = arith.constant 0 : index
    %2 = vector.load %arg3[%c0_2, %c0_3, %c0_4] : memref<1x16x32xf32, #tpu.memory_space<vmem>>, vector<1x16x32xf32>
    %3 = vector.shape_cast %2 : vector<1x16x32xf32> to vector<16x32xf32>
    %4 = arith.truncf %1 : vector<16x32xf32> to vector<16x32xbf16>
    %5 = arith.truncf %3 : vector<16x32xf32> to vector<16x32xbf16>
    %c0_5 = arith.constant 0 : index
    %c0_6 = arith.constant 0 : index
    %6 = vector.load %arg4[%c0_5, %c0_6] : memref<32x32xbf16, #tpu.memory_space<vmem>>, vector<32x32xbf16>
    %cst = arith.constant dense<0.000000e+00> : vector<16x32xf32>
    %7 = tpu.matmul %4, %6, %cst {dimension_numbers = #tpu.dot_dimension_numbers<[1], [0], [0], [1], [0, 0, 1, 1], [], []>} : vector<16x32xbf16>, vector<32x32xbf16>, vector<16x32xf32> -> vector<16x32xf32>
    %c0_7 = arith.constant 0 : index
    %c0_8 = arith.constant 0 : index
    %8 = vector.load %arg5[%c0_7, %c0_8] : memref<1x32xf32, #tpu.memory_space<vmem>>, vector<1x32xf32>
    %9 = vector.shape_cast %8 : vector<1x32xf32> to vector<32xf32>
    %10 = vector.shape_cast %9 : vector<32xf32> to vector<1x32xf32>
    %11 = vector.broadcast %10 : vector<1x32xf32> to vector<16x32xf32>
    %12 = arith.addf %7, %11 : vector<16x32xf32>
    %c0_9 = arith.constant 0 : index
    %c0_10 = arith.constant 0 : index
    %13 = vector.load %arg6[%c0_9, %c0_10] : memref<32x32xbf16, #tpu.memory_space<vmem>>, vector<32x32xbf16>
    %cst_11 = arith.constant dense<0.000000e+00> : vector<16x32xf32>
    %14 = tpu.matmul %5, %13, %cst_11 {dimension_numbers = #tpu.dot_dimension_numbers<[1], [0], [0], [1], [0, 0, 1, 1], [], []>} : vector<16x32xbf16>, vector<32x32xbf16>, vector<16x32xf32> -> vector<16x32xf32>
    %c0_12 = arith.constant 0 : index
    %c0_13 = arith.constant 0 : index
    %15 = vector.load %arg7[%c0_12, %c0_13] : memref<32x32xbf16, #tpu.memory_space<vmem>>, vector<32x32xbf16>
    %cst_14 = arith.constant dense<0.000000e+00> : vector<16x32xf32>
    %16 = tpu.matmul %5, %15, %cst_14 {dimension_numbers = #tpu.dot_dimension_numbers<[1], [0], [0], [1], [0, 0, 1, 1], [], []>} : vector<16x32xbf16>, vector<32x32xbf16>, vector<16x32xf32> -> vector<16x32xf32>
    %c0_15 = arith.constant 0 : index
    %c0_16 = arith.constant 0 : index
    %17 = vector.load %arg8[%c0_15, %c0_16] : memref<1x32xf32, #tpu.memory_space<vmem>>, vector<1x32xf32>
    %18 = vector.shape_cast %17 : vector<1x32xf32> to vector<32xf32>
    %19 = vector.shape_cast %18 : vector<32xf32> to vector<1x32xf32>
    %20 = vector.broadcast %19 : vector<1x32xf32> to vector<16x32xf32>
    %21 = arith.addf %16, %20 : vector<16x32xf32>
    %22 = arith.truncf %12 : vector<16x32xf32> to vector<16x32xbf16>
    %23 = arith.truncf %14 : vector<16x32xf32> to vector<16x32xbf16>
    %24 = arith.truncf %21 : vector<16x32xf32> to vector<16x32xbf16>
    %cst_17 = arith.constant 0.000000e+00 : f32
    %25 = vector.broadcast %cst_17 : f32 to vector<16x32xf32>
    %26 = vector.extract_strided_slice %22 {offsets = [0, 0], sizes = [16, 8], strides = [1, 1]} : vector<16x32xbf16> to vector<16x8xbf16>
    %27 = vector.extract_strided_slice %23 {offsets = [0, 0], sizes = [16, 8], strides = [1, 1]} : vector<16x32xbf16> to vector<16x8xbf16>
    %cst_18 = arith.constant dense<0.000000e+00> : vector<16x16xf32>
    %28 = tpu.matmul %26, %27, %cst_18 {dimension_numbers = #tpu.dot_dimension_numbers<[1], [1], [0], [0], [0, 0, 1, 0], [], []>} : vector<16x8xbf16>, vector<16x8xbf16>, vector<16x16xf32> -> vector<16x16xf32>
    %cst_19 = arith.constant 0.353553385 : f32
    %29 = vector.broadcast %cst_19 : f32 to vector<16x16xf32>
    %30 = arith.mulf %28, %29 : vector<16x16xf32>
    %cst_20 = arith.constant dense<0xFF800000> : vector<16xf32>
    %31 = vector.multi_reduction <maximumf>, %30, %cst_20 [1] : vector<16x16xf32> to vector<16xf32>
    %32 = vector.shape_cast %31 : vector<16xf32> to vector<16x1xf32>
    %33 = vector.broadcast %32 : vector<16x1xf32> to vector<16x16xf32>
    %34 = arith.subf %30, %33 : vector<16x16xf32>
    %35 = math.exp %34 : vector<16x16xf32>
    %cst_21 = arith.constant dense<0.000000e+00> : vector<16xf32>
    %36 = vector.multi_reduction <add>, %35, %cst_21 [1] : vector<16x16xf32> to vector<16xf32>
    %37 = vector.shape_cast %36 : vector<16xf32> to vector<16x1xf32>
    %38 = arith.truncf %35 : vector<16x16xf32> to vector<16x16xbf16>
    %39 = vector.extract_strided_slice %24 {offsets = [0, 0], sizes = [16, 8], strides = [1, 1]} : vector<16x32xbf16> to vector<16x8xbf16>
    %cst_22 = arith.constant dense<0.000000e+00> : vector<16x8xf32>
    %40 = tpu.matmul %38, %39, %cst_22 {dimension_numbers = #tpu.dot_dimension_numbers<[1], [0], [0], [1], [0, 0, 1, 1], [], []>} : vector<16x16xbf16>, vector<16x8xbf16>, vector<16x8xf32> -> vector<16x8xf32>
    %41 = tpu.reciprocal %37 {approx = true} : vector<16x1xf32> -> vector<16x1xf32>
    %42 = vector.broadcast %41 : vector<16x1xf32> to vector<16x8xf32>
    %43 = arith.mulf %40, %42 : vector<16x8xf32>
    %44 = arith.truncf %43 : vector<16x8xf32> to vector<16x8xbf16>
    %c0_23 = arith.constant 0 : index
    %c0_24 = arith.constant 0 : index
    %c0_25 = arith.constant 0 : index
    %45 = vector.load %arg9[%c0_23, %c0_24, %c0_25] : memref<4x8x32xbf16, #tpu.memory_space<vmem>>, vector<1x8x32xbf16>
    %46 = vector.shape_cast %45 : vector<1x8x32xbf16> to vector<8x32xbf16>
    %cst_26 = arith.constant dense<0.000000e+00> : vector<16x32xf32>
    %47 = tpu.matmul %44, %46, %cst_26 {dimension_numbers = #tpu.dot_dimension_numbers<[1], [0], [0], [1], [0, 0, 1, 1], [], []>} : vector<16x8xbf16>, vector<8x32xbf16>, vector<16x32xf32> -> vector<16x32xf32>
    %48 = arith.addf %25, %47 : vector<16x32xf32>
    %49 = vector.extract_strided_slice %22 {offsets = [0, 8], sizes = [16, 8], strides = [1, 1]} : vector<16x32xbf16> to vector<16x8xbf16>
    %50 = vector.extract_strided_slice %23 {offsets = [0, 8], sizes = [16, 8], strides = [1, 1]} : vector<16x32xbf16> to vector<16x8xbf16>
    %cst_27 = arith.constant dense<0.000000e+00> : vector<16x16xf32>
    %51 = tpu.matmul %49, %50, %cst_27 {dimension_numbers = #tpu.dot_dimension_numbers<[1], [1], [0], [0], [0, 0, 1, 0], [], []>} : vector<16x8xbf16>, vector<16x8xbf16>, vector<16x16xf32> -> vector<16x16xf32>
    %cst_28 = arith.constant 0.353553385 : f32
    %52 = vector.broadcast %cst_28 : f32 to vector<16x16xf32>
    %53 = arith.mulf %51, %52 : vector<16x16xf32>
    %cst_29 = arith.constant dense<0xFF800000> : vector<16xf32>
    %54 = vector.multi_reduction <maximumf>, %53, %cst_29 [1] : vector<16x16xf32> to vector<16xf32>
    %55 = vector.shape_cast %54 : vector<16xf32> to vector<16x1xf32>
    %56 = vector.broadcast %55 : vector<16x1xf32> to vector<16x16xf32>
    %57 = arith.subf %53, %56 : vector<16x16xf32>
    %58 = math.exp %57 : vector<16x16xf32>
    %cst_30 = arith.constant dense<0.000000e+00> : vector<16xf32>
    %59 = vector.multi_reduction <add>, %58, %cst_30 [1] : vector<16x16xf32> to vector<16xf32>
    %60 = vector.shape_cast %59 : vector<16xf32> to vector<16x1xf32>
    %61 = arith.truncf %58 : vector<16x16xf32> to vector<16x16xbf16>
    %62 = vector.extract_strided_slice %24 {offsets = [0, 8], sizes = [16, 8], strides = [1, 1]} : vector<16x32xbf16> to vector<16x8xbf16>
    %cst_31 = arith.constant dense<0.000000e+00> : vector<16x8xf32>
    %63 = tpu.matmul %61, %62, %cst_31 {dimension_numbers = #tpu.dot_dimension_numbers<[1], [0], [0], [1], [0, 0, 1, 1], [], []>} : vector<16x16xbf16>, vector<16x8xbf16>, vector<16x8xf32> -> vector<16x8xf32>
    %64 = tpu.reciprocal %60 {approx = true} : vector<16x1xf32> -> vector<16x1xf32>
    %65 = vector.broadcast %64 : vector<16x1xf32> to vector<16x8xf32>
    %66 = arith.mulf %63, %65 : vector<16x8xf32>
    %67 = arith.truncf %66 : vector<16x8xf32> to vector<16x8xbf16>
    %c1 = arith.constant 1 : index
    %c0_32 = arith.constant 0 : index
    %c0_33 = arith.constant 0 : index
    %68 = vector.load %arg9[%c1, %c0_32, %c0_33] : memref<4x8x32xbf16, #tpu.memory_space<vmem>>, vector<1x8x32xbf16>
    %69 = vector.shape_cast %68 : vector<1x8x32xbf16> to vector<8x32xbf16>
    %cst_34 = arith.constant dense<0.000000e+00> : vector<16x32xf32>
    %70 = tpu.matmul %67, %69, %cst_34 {dimension_numbers = #tpu.dot_dimension_numbers<[1], [0], [0], [1], [0, 0, 1, 1], [], []>} : vector<16x8xbf16>, vector<8x32xbf16>, vector<16x32xf32> -> vector<16x32xf32>
    %71 = arith.addf %48, %70 : vector<16x32xf32>
    %72 = vector.extract_strided_slice %22 {offsets = [0, 16], sizes = [16, 8], strides = [1, 1]} : vector<16x32xbf16> to vector<16x8xbf16>
    %73 = vector.extract_strided_slice %23 {offsets = [0, 16], sizes = [16, 8], strides = [1, 1]} : vector<16x32xbf16> to vector<16x8xbf16>
    %cst_35 = arith.constant dense<0.000000e+00> : vector<16x16xf32>
    %74 = tpu.matmul %72, %73, %cst_35 {dimension_numbers = #tpu.dot_dimension_numbers<[1], [1], [0], [0], [0, 0, 1, 0], [], []>} : vector<16x8xbf16>, vector<16x8xbf16>, vector<16x16xf32> -> vector<16x16xf32>
    %cst_36 = arith.constant 0.353553385 : f32
    %75 = vector.broadcast %cst_36 : f32 to vector<16x16xf32>
    %76 = arith.mulf %74, %75 : vector<16x16xf32>
    %cst_37 = arith.constant dense<0xFF800000> : vector<16xf32>
    %77 = vector.multi_reduction <maximumf>, %76, %cst_37 [1] : vector<16x16xf32> to vector<16xf32>
    %78 = vector.shape_cast %77 : vector<16xf32> to vector<16x1xf32>
    %79 = vector.broadcast %78 : vector<16x1xf32> to vector<16x16xf32>
    %80 = arith.subf %76, %79 : vector<16x16xf32>
    %81 = math.exp %80 : vector<16x16xf32>
    %cst_38 = arith.constant dense<0.000000e+00> : vector<16xf32>
    %82 = vector.multi_reduction <add>, %81, %cst_38 [1] : vector<16x16xf32> to vector<16xf32>
    %83 = vector.shape_cast %82 : vector<16xf32> to vector<16x1xf32>
    %84 = arith.truncf %81 : vector<16x16xf32> to vector<16x16xbf16>
    %85 = vector.extract_strided_slice %24 {offsets = [0, 16], sizes = [16, 8], strides = [1, 1]} : vector<16x32xbf16> to vector<16x8xbf16>
    %cst_39 = arith.constant dense<0.000000e+00> : vector<16x8xf32>
    %86 = tpu.matmul %84, %85, %cst_39 {dimension_numbers = #tpu.dot_dimension_numbers<[1], [0], [0], [1], [0, 0, 1, 1], [], []>} : vector<16x16xbf16>, vector<16x8xbf16>, vector<16x8xf32> -> vector<16x8xf32>
    %87 = tpu.reciprocal %83 {approx = true} : vector<16x1xf32> -> vector<16x1xf32>
    %88 = vector.broadcast %87 : vector<16x1xf32> to vector<16x8xf32>
    %89 = arith.mulf %86, %88 : vector<16x8xf32>
    %90 = arith.truncf %89 : vector<16x8xf32> to vector<16x8xbf16>
    %c2 = arith.constant 2 : index
    %c0_40 = arith.constant 0 : index
    %c0_41 = arith.constant 0 : index
    %91 = vector.load %arg9[%c2, %c0_40, %c0_41] : memref<4x8x32xbf16, #tpu.memory_space<vmem>>, vector<1x8x32xbf16>
    %92 = vector.shape_cast %91 : vector<1x8x32xbf16> to vector<8x32xbf16>
    %cst_42 = arith.constant dense<0.000000e+00> : vector<16x32xf32>
    %93 = tpu.matmul %90, %92, %cst_42 {dimension_numbers = #tpu.dot_dimension_numbers<[1], [0], [0], [1], [0, 0, 1, 1], [], []>} : vector<16x8xbf16>, vector<8x32xbf16>, vector<16x32xf32> -> vector<16x32xf32>
    %94 = arith.addf %71, %93 : vector<16x32xf32>
    %95 = vector.extract_strided_slice %22 {offsets = [0, 24], sizes = [16, 8], strides = [1, 1]} : vector<16x32xbf16> to vector<16x8xbf16>
    %96 = vector.extract_strided_slice %23 {offsets = [0, 24], sizes = [16, 8], strides = [1, 1]} : vector<16x32xbf16> to vector<16x8xbf16>
    %cst_43 = arith.constant dense<0.000000e+00> : vector<16x16xf32>
    %97 = tpu.matmul %95, %96, %cst_43 {dimension_numbers = #tpu.dot_dimension_numbers<[1], [1], [0], [0], [0, 0, 1, 0], [], []>} : vector<16x8xbf16>, vector<16x8xbf16>, vector<16x16xf32> -> vector<16x16xf32>
    %cst_44 = arith.constant 0.353553385 : f32
    %98 = vector.broadcast %cst_44 : f32 to vector<16x16xf32>
    %99 = arith.mulf %97, %98 : vector<16x16xf32>
    %cst_45 = arith.constant dense<0xFF800000> : vector<16xf32>
    %100 = vector.multi_reduction <maximumf>, %99, %cst_45 [1] : vector<16x16xf32> to vector<16xf32>
    %101 = vector.shape_cast %100 : vector<16xf32> to vector<16x1xf32>
    %102 = vector.broadcast %101 : vector<16x1xf32> to vector<16x16xf32>
    %103 = arith.subf %99, %102 : vector<16x16xf32>
    %104 = math.exp %103 : vector<16x16xf32>
    %cst_46 = arith.constant dense<0.000000e+00> : vector<16xf32>
    %105 = vector.multi_reduction <add>, %104, %cst_46 [1] : vector<16x16xf32> to vector<16xf32>
    %106 = vector.shape_cast %105 : vector<16xf32> to vector<16x1xf32>
    %107 = arith.truncf %104 : vector<16x16xf32> to vector<16x16xbf16>
    %108 = vector.extract_strided_slice %24 {offsets = [0, 24], sizes = [16, 8], strides = [1, 1]} : vector<16x32xbf16> to vector<16x8xbf16>
    %cst_47 = arith.constant dense<0.000000e+00> : vector<16x8xf32>
    %109 = tpu.matmul %107, %108, %cst_47 {dimension_numbers = #tpu.dot_dimension_numbers<[1], [0], [0], [1], [0, 0, 1, 1], [], []>} : vector<16x16xbf16>, vector<16x8xbf16>, vector<16x8xf32> -> vector<16x8xf32>
    %110 = tpu.reciprocal %106 {approx = true} : vector<16x1xf32> -> vector<16x1xf32>
    %111 = vector.broadcast %110 : vector<16x1xf32> to vector<16x8xf32>
    %112 = arith.mulf %109, %111 : vector<16x8xf32>
    %113 = arith.truncf %112 : vector<16x8xf32> to vector<16x8xbf16>
    %c3 = arith.constant 3 : index
    %c0_48 = arith.constant 0 : index
    %c0_49 = arith.constant 0 : index
    %114 = vector.load %arg9[%c3, %c0_48, %c0_49] : memref<4x8x32xbf16, #tpu.memory_space<vmem>>, vector<1x8x32xbf16>
    %115 = vector.shape_cast %114 : vector<1x8x32xbf16> to vector<8x32xbf16>
    %cst_50 = arith.constant dense<0.000000e+00> : vector<16x32xf32>
    %116 = tpu.matmul %113, %115, %cst_50 {dimension_numbers = #tpu.dot_dimension_numbers<[1], [0], [0], [1], [0, 0, 1, 1], [], []>} : vector<16x8xbf16>, vector<8x32xbf16>, vector<16x32xf32> -> vector<16x32xf32>
    %117 = arith.addf %94, %116 : vector<16x32xf32>
    %c0_51 = arith.constant 0 : index
    %c0_52 = arith.constant 0 : index
    %118 = vector.load %arg10[%c0_51, %c0_52] : memref<1x32xf32, #tpu.memory_space<vmem>>, vector<1x32xf32>
    %119 = vector.shape_cast %118 : vector<1x32xf32> to vector<32xf32>
    %120 = vector.shape_cast %119 : vector<32xf32> to vector<1x32xf32>
    %121 = vector.broadcast %120 : vector<1x32xf32> to vector<16x32xf32>
    %122 = arith.addf %117, %121 : vector<16x32xf32>
    %c0_53 = arith.constant 0 : index
    %c0_54 = arith.constant 0 : index
    %123 = vector.load %arg11[%c0_53, %c0_54] : memref<32x64xbf16, #tpu.memory_space<vmem>>, vector<32x64xbf16>
    %cst_55 = arith.constant dense<0.000000e+00> : vector<16x64xf32>
    %124 = tpu.matmul %4, %123, %cst_55 {dimension_numbers = #tpu.dot_dimension_numbers<[1], [0], [0], [1], [0, 0, 1, 1], [], []>} : vector<16x32xbf16>, vector<32x64xbf16>, vector<16x64xf32> -> vector<16x64xf32>
    %125 = arith.truncf %122 : vector<16x32xf32> to vector<16x32xbf16>
    %c0_56 = arith.constant 0 : index
    %c0_57 = arith.constant 0 : index
    %126 = vector.load %arg12[%c0_56, %c0_57] : memref<32x64xbf16, #tpu.memory_space<vmem>>, vector<32x64xbf16>
    %cst_58 = arith.constant dense<0.000000e+00> : vector<16x64xf32>
    %127 = tpu.matmul %125, %126, %cst_58 {dimension_numbers = #tpu.dot_dimension_numbers<[1], [0], [0], [1], [0, 0, 1, 1], [], []>} : vector<16x32xbf16>, vector<32x64xbf16>, vector<16x64xf32> -> vector<16x64xf32>
    %128 = arith.addf %124, %127 : vector<16x64xf32>
    %c0_59 = arith.constant 0 : index
    %c0_60 = arith.constant 0 : index
    %129 = vector.load %arg13[%c0_59, %c0_60] : memref<1x64xf32, #tpu.memory_space<vmem>>, vector<1x64xf32>
    %130 = vector.shape_cast %129 : vector<1x64xf32> to vector<64xf32>
    %131 = vector.shape_cast %130 : vector<64xf32> to vector<1x64xf32>
    %132 = vector.broadcast %131 : vector<1x64xf32> to vector<16x64xf32>
    %133 = arith.addf %128, %132 : vector<16x64xf32>
    %cst_61 = arith.constant 0.000000e+00 : f32
    %134 = vector.broadcast %cst_61 : f32 to vector<16x64xf32>
    %135 = arith.maximumf %133, %134 : vector<16x64xf32>
    %136 = arith.truncf %135 : vector<16x64xf32> to vector<16x64xbf16>
    %c0_62 = arith.constant 0 : index
    %c0_63 = arith.constant 0 : index
    %137 = vector.load %arg14[%c0_62, %c0_63] : memref<64x32xbf16, #tpu.memory_space<vmem>>, vector<64x32xbf16>
    %cst_64 = arith.constant dense<0.000000e+00> : vector<16x32xf32>
    %138 = tpu.matmul %136, %137, %cst_64 {dimension_numbers = #tpu.dot_dimension_numbers<[1], [0], [0], [1], [0, 0, 1, 1], [], []>} : vector<16x64xbf16>, vector<64x32xbf16>, vector<16x32xf32> -> vector<16x32xf32>
    %c0_65 = arith.constant 0 : index
    %c0_66 = arith.constant 0 : index
    %139 = vector.load %arg15[%c0_65, %c0_66] : memref<1x32xf32, #tpu.memory_space<vmem>>, vector<1x32xf32>
    %140 = vector.shape_cast %139 : vector<1x32xf32> to vector<32xf32>
    %141 = vector.shape_cast %140 : vector<32xf32> to vector<1x32xf32>
    %142 = vector.broadcast %141 : vector<1x32xf32> to vector<16x32xf32>
    %143 = arith.addf %138, %142 : vector<16x32xf32>
    %144 = arith.addf %1, %143 : vector<16x32xf32>
    %c0_67 = arith.constant 0 : index
    %c0_68 = arith.constant 0 : index
    %c0_69 = arith.constant 0 : index
    %145 = vector.load %arg16[%c0_67, %c0_68, %c0_69] : memref<1x16x32xf32, #tpu.memory_space<vmem>>, vector<1x16x32xf32>
    %146 = vector.shape_cast %145 : vector<1x16x32xf32> to vector<16x32xf32>
    %147 = vector.shape_cast %144 : vector<16x32xf32> to vector<1x16x32xf32>
    tpu.vector_store %arg16[%c0_67, %c0_68, %c0_69], %147 {strides = array<i32>} : memref<1x16x32xf32, #tpu.memory_space<vmem>>, vector<1x16x32xf32>,
    return
  }
  func.func @transform_0(%arg0: i32, %arg1: i32) -> (i32, i32, i32) {
    %c0_i32 = arith.constant 0 : i32
    %c0_i32_0 = arith.constant 0 : i32
    return %arg0, %arg1, %c0_i32 : i32, i32, i32
  }
  func.func @transform_1(%arg0: i32, %arg1: i32) -> (i32, i32, i32) {
    %c0_i32 = arith.constant 0 : i32
    %c0_i32_0 = arith.constant 0 : i32
    %c0_i32_1 = arith.constant 0 : i32
    return %arg0, %c0_i32, %c0_i32_0 : i32, i32, i32
  }
  func.func @transform_2(%arg0: i32, %arg1: i32) -> (i32, i32) {
    %c0_i32 = arith.constant 0 : i32
    %c0_i32_0 = arith.constant 0 : i32
    %c0_i32_1 = arith.constant 0 : i32
    return %c0_i32, %c0_i32_0 : i32, i32
  }
  func.func @transform_3(%arg0: i32, %arg1: i32) -> (i32, i32) {
    %c0_i32 = arith.constant 0 : i32
    %c0_i32_0 = arith.constant 0 : i32
    %c0_i32_1 = arith.constant 0 : i32
    return %c0_i32, %c0_i32_0 : i32, i32
  }
  func.func @transform_4(%arg0: i32, %arg1: i32) -> (i32, i32) {
    %c0_i32 = arith.constant 0 : i32
    %c0_i32_0 = arith.constant 0 : i32
    %c0_i32_1 = arith.constant 0 : i32
    return %c0_i32, %c0_i32_0 : i32, i32
  }
  func.func @transform_5(%arg0: i32, %arg1: i32) -> (i32, i32) {
    %c0_i32 = arith.constant 0 : i32
    %c0_i32_0 = arith.constant 0 : i32
    %c0_i32_1 = arith.constant 0 : i32
    return %c0_i32, %c0_i32_0 : i32, i32
  }
  func.func @transform_6(%arg0: i32, %arg1: i32) -> (i32, i32) {
    %c0_i32 = arith.constant 0 : i32
    %c0_i32_0 = arith.constant 0 : i32
    %c0_i32_1 = arith.constant 0 : i32
    return %c0_i32, %c0_i32_0 : i32, i32
  }
  func.func @transform_7(%arg0: i32, %arg1: i32) -> (i32, i32, i32) {
    %c0_i32 = arith.constant 0 : i32
    %c0_i32_0 = arith.constant 0 : i32
    %c0_i32_1 = arith.constant 0 : i32
    %c0_i32_2 = arith.constant 0 : i32
    return %c0_i32, %c0_i32_0, %c0_i32_1 : i32, i32, i32
  }
  func.func @transform_8(%arg0: i32, %arg1: i32) -> (i32, i32) {
    %c0_i32 = arith.constant 0 : i32
    %c0_i32_0 = arith.constant 0 : i32
    %c0_i32_1 = arith.constant 0 : i32
    return %c0_i32, %c0_i32_0 : i32, i32
  }
  func.func @transform_9(%arg0: i32, %arg1: i32) -> (i32, i32) {
    %c0_i32 = arith.constant 0 : i32
    %c0_i32_0 = arith.constant 0 : i32
    %c0_i32_1 = arith.constant 0 : i32
    return %c0_i32, %c0_i32_0 : i32, i32
  }
  func.func @transform_10(%arg0: i32, %arg1: i32) -> (i32, i32) {
    %c0_i32 = arith.constant 0 : i32
    %c0_i32_0 = arith.constant 0 : i32
    %c0_i32_1 = arith.constant 0 : i32
    return %c0_i32, %c0_i32_0 : i32, i32
  }
  func.func @transform_11(%arg0: i32, %arg1: i32) -> (i32, i32) {
    %c0_i32 = arith.constant 0 : i32
    %c0_i32_0 = arith.constant 0 : i32
    %c0_i32_1 = arith.constant 0 : i32
    return %c0_i32, %c0_i32_0 : i32, i32
  }
  func.func @transform_12(%arg0: i32, %arg1: i32) -> (i32, i32) {
    %c0_i32 = arith.constant 0 : i32
    %c0_i32_0 = arith.constant 0 : i32
    %c0_i32_1 = arith.constant 0 : i32
    return %c0_i32, %c0_i32_0 : i32, i32
  }
  func.func @transform_13(%arg0: i32, %arg1: i32) -> (i32, i32) {
    %c0_i32 = arith.constant 0 : i32
    %c0_i32_0 = arith.constant 0 : i32
    %c0_i32_1 = arith.constant 0 : i32
    return %c0_i32, %c0_i32_0 : i32, i32
  }
  func.func @transform_14(%arg0: i32, %arg1: i32) -> (i32, i32, i32) {
    %c0_i32 = arith.constant 0 : i32
    %c0_i32_0 = arith.constant 0 : i32
    return %arg0, %arg1, %c0_i32 : i32, i32, i32
  }
}

</mosaic_0001>

<bundles_post_ra>
// kernel: tpu_custom_call.1
= control target key start
LH: loop header
LB: loop body
LE: loop exit
PB: predicated region body
PF: predicated region fallthrough
CT: control target
= control target key end

     0   :  { %s3140_s0 = inlined_call_operand.hbm [shape: f32[4,16,32], index: 0, kind: input, shape index: {}]   ;;  %s3141_s1 = inlined_call_operand.hbm [shape: f32[4,16,32], index: 1, kind: input, shape index: {}]   ;;  %s3142_s2 = inlined_call_operand.vmem [shape: bf16[32,32], index: 2, kind: input, shape index: {}]   ;;  %s3143_s3 = inlined_call_operand.hbm [shape: f32[1,32], index: 3, kind: input, shape index: {}]   ;;  %s3144_s4 = inlined_call_operand.vmem [shape: bf16[32,32], index: 4, kind: input, shape index: {}]   ;;  %s3145_s5 = inlined_call_operand.vmem [shape: bf16[32,32], index: 5, kind: input, shape index: {}]   ;;  %s3146_s6 = inlined_call_operand.hbm [shape: f32[1,32], index: 6, kind: input, shape index: {}]   ;;  %s3147_s7 = inlined_call_operand.hbm [shape: bf16[4,8,32], index: 7, kind: input, shape index: {}]   ;;  %s3148_s8 = inlined_call_operand.hbm [shape: f32[1,32], index: 8, kind: input, shape index: {}]   ;;  %s3149_s9 = inlined_call_operand.vmem [shape: bf16[32,64], index: 9, kind: input, shape index: {}]   ;;  %s3150_s10 = inlined_call_operand.hbm [shape: bf16[32,64], index: 10, kind: input, shape index: {}]   ;;  %s3151_s11 = inlined_call_operand.vmem [shape: f32[1,64], index: 11, kind: input, shape index: {}]   ;;  %s3152_s12 = inlined_call_operand.vmem [shape: bf16[64,32], index: 12, kind: input, shape index: {}]   ;;  %s3153_s13 = inlined_call_operand.vmem [shape: f32[1,32], index: 13, kind: input, shape index: {}]   ;;  %s3154_s14 = inlined_call_operand.hbm [shape: f32[4,16,32], index: 14, kind: output, shape index: {}]  }
   0x1   :  { %3165 = sst [smem:[#allocation29_spill]] %s3140_s0 }
   0x2   :  { %3166 = sst [smem:[#allocation30_spill]] %s3143_s3 }
   0x3   :  { %3167 = sst [smem:[#allocation31_spill]] %s3146_s6 }
   0x4   :  { %3168 = sst [smem:[#allocation32_spill]] %s3147_s7 }
   0x5   :  { %3169 = sst [smem:[#allocation33_spill]] %s3148_s8 }
   0x6   :  { %3170 = sst [smem:[#allocation34_spill]] %s3150_s10 }
   0x7   :  { %3171 = sst [smem:[#allocation35_spill]] %s3153_s13 }
   0x8   :  { %3172 = sst [smem:[#allocation36_spill]] %s3154_s14 }
   0x9   :  { %19 = vsyncpa [#allocation3], 0 }
   0xa   :  { %21 = vsyncpa [#allocation3 + $0x1], 0 }
   0xb   :  { %22 = vsyncpa [#allocation6], 0 }
   0xc   :  { %24 = vsyncpa [#allocation6 + $0x1], 0 }
   0xd   :  { %25 = vsyncpa [#allocation9], 0 }
   0xe   :  { %26 = vsyncpa [#allocation12], 0 }
   0xf   :  { %27 = vsyncpa [#allocation4], 0 }
  0x10   :  { %29 = vsyncpa [#allocation4 + $0x1], 0  ;;  %s2698_s29 = smov 0   ;;  %s2700_s30 = smov 0  }
  0x11   :  { %s2702_s15 = smov 0   ;;  %s2704_s16 = smov 0  }
  0x12   :  { %s2706_s17 = smov 0   ;;  %s2708_s18 = smov 0  }
  0x13 LB: > { %3173 = sst [smem:[#allocation21_spill]] %s2582_s29  ;;  %s2729_s19 = sadd.s32 4294967295, %s2602_s18   ;;  %s2602_s18 = sphi %s2708_s18, %s35_s18   ;;  %s2598_s17 = sphi %s2706_s17, %s3212_s17   ;;  %s2594_s16 = sphi %s2704_s16, %s3211_s16   ;;  %s2590_s15 = sphi %s2702_s15, %s3210_s15   ;;  %s2586_s30 = sphi %s2700_s30, %s3214_s30   ;;  %s2582_s29 = sphi %s2698_s29, %s3213_s29  }
  0x14   : > { %3174 = sst [smem:[#allocation22_spill]] %s2590_s15  ;;  %p1910_p0 = scmp.ge.s32.totalorder %s2602_s18, 1 }
  0x15   : > { %3175 = sst [smem:[#allocation23_spill]] %s2594_s16  ;;  %p3156_p1 = scmp.eq.s32.totalorder %s2729_s19, 0 }
  0x16   : > { %3176 = sst [smem:[#allocation24_spill]] %s2598_s17  ;;  %p386_p2 = scmp.lt.s32.totalorder %s2602_s18, 5 }
  0x17   : > { %s2604_s21 = smov [#allocation7]   ;;  %s2605_s23 = smov [#allocation8]  }
  0x18   : > { %p2734_p3 = pnand %p1910_p0, %p386_p2  ;;  %s402_s22 = sshll.u32 %s2604_s21, 4  ;;  %s403_s22 = int_to_ptr.vmem [resolvable:$true] %s402_s22 }
  0x19   : > { %s419_s24 = sshll.u32 %s2605_s23, 4  ;;  %s2606_s26 = smov [#allocation11]   ;;  %s420_s24 = int_to_ptr.vmem [resolvable:$true] %s419_s24 }
  0x1a   : > { %s3177_s20 = scalar_select %p2734_p3, 1, 0 }
  0x1b   : > { %p2171_p4 = pneg %p2734_p3  ;;  %s443_s27 = sshll.u32 %s2606_s26, 4  ;;  %s2746_s27 = int_to_ptr.vmem [resolvable:$true] %s443_s27 }
  0x1c   : > { %s2331_s21 = scalar_lea.vmem %s403_s22, 16  ;;  %s2338_s23 = scalar_lea.vmem %s403_s22, 32 }
  0x1d   : > { %p2742_p5 = pnand %p2171_p4, %p3156_p1  ;;  %p2332_p7 = scmp.ne.s32.totalorder %s403_s22, %s2331_s21 }
  0x1e   : > { %p2339_p10 = scmp.lt.s32.totalorder %s403_s22, %s403_s22  ;;  %p2340_p11 = scmp.lt.s32.totalorder %s2338_s23, %s2331_s21 }
  0x1f   : > { %p2750_p6 = pneg %p2742_p5 }
  0x20   : > { %p2341_p12 = por %p2340_p11, %p2339_p10 }
  0x21   : > { %p2334_p8 = pnand %p2332_p7, %p2750_p6 }
  0x23   : > { %p2335_p9 = pneg %p2334_p8 }
  0x25   : > { %p2342_p13 = pnand %p2341_p12, %p2335_p9 }
  0x27   : > { %2345 = shalt.err (!%p2342_p13)
}
  0x28   : > { %s3180_s3 = sld [smem:[#allocation30_spill]]  ;;  %s2357_s13 = scalar_lea.vmem %s420_s24, 16 }
  0x29   : > { %p2358_p0 = scmp.ne.s32.totalorder %s420_s24, %s2357_s13  ;;  %s2364_s16 = scalar_lea.vmem %s420_s24, 32 }
  0x2a   : > { %p2365_p7 = scmp.lt.s32.totalorder %s420_s24, %s420_s24  ;;  %p2366_p8 = scmp.lt.s32.totalorder %s2364_s16, %s2357_s13 }
  0x2b   : > { %p2360_p2 = pnand %p2358_p0, %p2750_p6 }
  0x2c   : > { %p2367_p1 = por %p2366_p8, %p2365_p7 }
  0x2d   : > { %p2361_p4 = pneg %p2360_p2 }
  0x2e   : > { %2174 = dma.hbm_to_vmem [thread:$0]  (!%p2742_p5), %s3180_s3, 16, %s403_s22, [#allocation6]  }
  0x2f   : > { %p2368_p3 = pnand %p2367_p1, %p2361_p4 }
  0x31   : > { %2371 = shalt.err (!%p2368_p3)
}
  0x32   : > { %s3181_s6 = sld [smem:[#allocation31_spill]]  ;;  %s2383_s14 = scalar_lea.vmem %s2746_s27, 16 }
  0x33   : > { %p2384_p9 = scmp.ne.s32.totalorder %s2746_s27, %s2383_s14  ;;  %s2390_s13 = scalar_lea.vmem %s2746_s27, 32 }
  0x34   : > { %p2391_p1 = scmp.lt.s32.totalorder %s2746_s27, %s2746_s27  ;;  %p2392_p3 = scmp.lt.s32.totalorder %s2390_s13, %s2383_s14 }
  0x35   : > { %p2386_p10 = pnand %p2384_p9, %p2750_p6 }
  0x36   : > { %p2393_p12 = por %p2392_p3, %p2391_p1 }
  0x37   : > { %p2387_p11 = pneg %p2386_p10 }
  0x38   : > { %2177 = dma.hbm_to_vmem [thread:$0]  (!%p2742_p5), %s3181_s6, 16, %s420_s24, [#allocation9]  }
  0x39   : > { %p2394_p13 = pnand %p2393_p12, %p2387_p11 }
  0x3b   : > { %2397 = shalt.err (!%p2394_p13)
}
  0x3c   : > { %s3182_s8 = sld [smem:[#allocation33_spill]]  ;;  %s2607_s24 = smov [#allocation10]  }
  0x3d   : > { %s429_s26 = sshll.u32 %s2607_s24, 4  ;;  %s430_s26 = int_to_ptr.vmem [resolvable:$true] %s429_s26 }
  0x3e   : > { %s2409_s21 = scalar_lea.vmem %s430_s26, 256  ;;  %p2417_p7 = scmp.lt.s32.totalorder %s430_s26, %s430_s26 }
  0x3f   : > { %p2410_p0 = scmp.ne.s32.totalorder %s430_s26, %s2409_s21  ;;  %p2418_p8 = scmp.lt.s32.totalorder %s2409_s21, %s2409_s21 }
  0x41   : > { %p2412_p2 = pnand %p2410_p0, %p2750_p6  ;;  %p2419_p9 = por %p2418_p8, %p2417_p7 }
  0x42   : > { %2183 = dma.hbm_to_vmem [thread:$0]  (!%p2742_p5), %s3182_s8, 16, %s2746_s27, [#allocation12]  }
  0x43   : > { %p2413_p4 = pneg %p2412_p2 }
  0x45   : > { %p2420_p10 = pnand %p2419_p9, %p2413_p4 }
  0x47   : > { %2423 = shalt.err (!%p2420_p10)
}
  0x48   : > { %s2608_s23 = smov 64   ;;  %s2609_s14 = smov 4  }
  0x49   : > { %s3183_s7 = sld [smem:[#allocation32_spill]]  ;;  %s2610_s16 = smov [#allocation13]  }
  0x4a   : > { %s456_s22 = sshll.u32 %s2610_s16, 4  ;;  %s457_s22 = int_to_ptr.vmem [resolvable:$true] %s456_s22 }
  0x4b   : > { %s2435_s24 = scalar_lea.vmem %s457_s22, 256  ;;  %p2443_p12 = scmp.lt.s32.totalorder %s457_s22, %s457_s22 }
  0x4c   : > { %p2436_p11 = scmp.ne.s32.totalorder %s457_s22, %s2435_s24  ;;  %p2444_p13 = scmp.lt.s32.totalorder %s2435_s24, %s2435_s24 }
  0x4e   : > { %p2438_p1 = pnand %p2436_p11, %p2750_p6  ;;  %p2445_p0 = por %p2444_p13, %p2443_p12 }
  0x4f   : > { %2180 = dma.hbm_to_vmem [thread:$0]  (!%p2742_p5), %s3183_s7, 256, %s430_s26, [#allocation9], %s2608_s23, %s2608_s23, %s2609_s14  }
  0x50   : > { %p2439_p3 = pneg %p2438_p1 }
  0x52   : > { %p2446_p2 = pnand %p2445_p0, %p2439_p3 }
  0x54   : > { %2449 = shalt.err (!%p2446_p2)
}
  0x55   : > { %s3184_s10 = sld [smem:[#allocation34_spill]]  ;;  %s1909_s28 = sadd.s32 4294967294, %s2602_s18  }
  0x56   : > { %s47_s26 = sadd.s32 1, %s2598_s17  ;;  %s56_s25 = sadd.s32 1, %s2590_s15 }
  0x57   : > { %p49_p6 = scmp.ge.s32.totalorder %s47_s26, 4  ;;  %p63_p4 = scmp.ne.s32.totalorder %s2590_s15, %s2586_s30 }
  0x58   : > { %p64_p7 = scmp.eq.s32.totalorder %s2602_s18, 0  ;;  %p69_p8 = scmp.ne.s32.totalorder %s2586_s30, %s2582_s29 }
  0x59   : > { %s3216_s26 = smov (%p49_p6, %s47_s26), 0  ;;  %p3187_p10 = scmp.eq.s32.totalorder %s2729_s19, 0 }
  0x5a   : > { %3185 = sst [smem:[#allocation25_spill]] %s3216_s26  ;;  %p2805_p9 = por %p64_p7, %p63_p4 }
  0x5b   : > { %2186 = dma.hbm_to_vmem [thread:$0]  (!%p2742_p5), %s3184_s10, 256, %s457_s22, [#allocation12], %s2608_s23, %s2608_s23, %s2609_s14  }
  0x5c   : > { %p2811_p5 = por %p3187_p10, %p69_p8  ;;  %s51_s14 = ssub.s32 %s2598_s17, %s3216_s26 }
  0x5d   : > { %p373_p11 = scmp.eq.s32.totalorder %s2729_s19, 3  ;;  %p54_p1 = scmp.eq.s32.totalorder %s51_s14, 0 }
  0x5e   : > { %p379_p3 = scmp.eq.s32.totalorder %s1909_s28, 3  ;;  %p2203_p13 = scmp.lt.s32.totalorder %s2602_s18, 4 }
  0x5f   : > { %p2818_p12 = por %p373_p11, %p63_p4  ;;  %s479_s22 = sand.u32 1, %s2590_s15  }
  0x60   : > { %s2824_s27 = scalar_select %p54_p1, %s2590_s15, %s56_s25  }
  0x61   : > { %s3189_s13 = scalar_select %p2818_p12, 1, 0 }
  0x62   : > { %3191 = sst [smem:[#allocation27_spill]] %s2824_s27  ;;  %p2826_p0 = por %p379_p3, %p69_p8 }
  0x63   : > { %3190 = sst [smem:[#allocation26_spill]] %s3189_s13  ;;  %s2831_s24 = sshll.u32 %s479_s22, 4 }
  0x64   : > { %s3192_s16 = scalar_select %p2826_p0, 1, 0 }
  0x65   : > { %s1974_s21 = sshll.u32 %s2598_s17, 8  ;;  %s3194_s0 = sld [smem:[#allocation29_spill]] }
  0x66   : > { %3193 = sst [smem:[#allocation28_spill]] %s3192_s16  ;;  %s483_s14 = scalar_lea.vmem [#allocation2], %s2831_s24 }
  0x67   : > { %s492_s8 = sshll.u32 %s483_s14, 4  ;;  %p2840_p2 = pnand %p2203_p13, %p2805_p9  ;;  %s493_s8 = int_to_ptr.vmem [resolvable:$true] %s492_s8 }
  0x68   : > { %s480_s10 = scalar_lea.sflag [#allocation3], %s479_s22  ;;  %s2463_s26 = scalar_lea.vmem %s493_s8, 256 }
  0x69   : > { %p2452_p6 = pneg %p2840_p2  ;;  %p2464_p4 = scmp.ne.s32.totalorder %s493_s8, %s2463_s26 }
  0x6a   : > { %s2611_s6 = smov [#allocation2]  }
  0x6b   : > { %s491_s28 = scalar_lea.hbm %s3194_s0, %s1974_s21  ;;  %p2466_p7 = pnand %p2464_p4, %p2452_p6 }
  0x6c   : > { %s2468_s7 = sshll.u32 %s2611_s6, 4  ;;  %s2469_s7 = int_to_ptr.vmem [resolvable:$false] %s2468_s7 }
  0x6d   : > { %p2467_p8 = pneg %p2466_p7  ;;  %s2470_s14 = scalar_lea.vmem %s2469_s7, 512 }
  0x6e   : > { %p2471_p10 = scmp.lt.s32.totalorder %s493_s8, %s2469_s7  ;;  %p2472_p9 = scmp.lt.s32.totalorder %s2470_s14, %s2463_s26 }
  0x70   : > { %p2473_p11 = por %p2472_p9, %p2471_p10 }
  0x72   : > { %p2474_p1 = pnand %p2473_p11, %p2467_p8 }
  0x74   : > { %2477 = shalt.err (!%p2474_p1)
}
  0x75   : > { %s2612_s3 = smov 128   ;;  %s2613_s22 = smov 8  }
  0x76   : > { %2190 = dma.hbm_to_vmem [thread:$0]  (!%p2840_p2), %s491_s28, 256, %s493_s8, %s480_s10, %s2612_s3, %s2612_s3, %s2613_s22  }
  0x77   : > { %s512_s27 = scalar_lea.hbm %s3141_s1, %s1974_s21  ;;  %s506_s6 = scalar_lea.vmem [#allocation5], %s2831_s24 }
  0x78   : > { %s513_s15 = sshll.u32 %s506_s6, 4  ;;  %s502_s7 = sand.u32 1, %s2602_s18   ;;  %s514_s15 = int_to_ptr.vmem [resolvable:$true] %s513_s15 }
  0x79   : > { %s503_s26 = scalar_lea.sflag [#allocation6], %s502_s7  ;;  %s2491_s14 = scalar_lea.vmem %s514_s15, 256 }
  0x7a   : > { %p2492_p3 = scmp.ne.s32.totalorder %s514_s15, %s2491_s14  ;;  %s2614_s16 = smov [#allocation5]  }
  0x7b   : > { %s2496_s29 = sshll.u32 %s2614_s16, 4  ;;  %s2497_s29 = int_to_ptr.vmem [resolvable:$false] %s2496_s29 }
  0x7c   : > { %p2494_p13 = pnand %p2492_p3, %p2452_p6  ;;  %s2498_s13 = scalar_lea.vmem %s2497_s29, 512 }
  0x7d   : > { %p2499_p7 = scmp.lt.s32.totalorder %s514_s15, %s2497_s29  ;;  %p2500_p8 = scmp.lt.s32.totalorder %s2498_s13, %s2491_s14 }
  0x7e   : > { %p2495_p4 = pneg %p2494_p13 }
  0x7f   : > { %p2501_p10 = por %p2500_p8, %p2499_p7 }
  0x81   : > { %p2502_p9 = pnand %p2501_p10, %p2495_p4 }
  0x83   : > { %2505 = shalt.err (!%p2502_p9)
}
  0x84   : > { %2193 = dma.hbm_to_vmem [thread:$0]  (!%p2840_p2), %s512_s27, 256, %s514_s15, %s503_s26, %s2612_s3, %s2612_s3, %s2613_s22  }
  0x85   : > { %p3196_p11 = scmp.ne.s32.totalorder %s3177_s20, 0 }
  0x86   : > { %s2864_s0 = sand.u32 (!%p3196_p11), 1, %s2586_s30  }
  0x87   : > { %525 = sbr.rel (%p3196_p11) target bundleno = 2600 (0xa28), region = 76  ;;  %s2867_s8 = sshll.u32 (!%p3196_p11), %s2864_s0, 4 }
  0x88   : > { %s528_s10 = scalar_lea.sflag (!%p3196_p11), [#allocation3], %s2864_s0  ;;  %s531_s29 = scalar_lea.vmem (!%p3196_p11), [#allocation2], %s2867_s8 }
  0x8c   : > { %2557 = dma.done.wait (%p2811_p5), %s528_s10, 256  }
  0x8d   : > { %2559 = vsyncadd (%p2811_p5), %s528_s10, 4294967040  ;;  %s536_s15 = sand.u32 1, %s2729_s19   ;;  %s540_s20 = scalar_lea.vmem [#allocation5], %s2867_s8 }
  0x8e   : > { %s537_s17 = scalar_lea.sflag [#allocation6], %s536_s15 }
  0x8f   : > { %2561 = dma.done.wait (%p2811_p5), %s537_s17, 256  }
  0x90   : > { %2563 = vsyncadd (%p2811_p5), %s537_s17, 4294967040  ;;  %p3197_p2 = scmp.eq.s32.totalorder %s2729_s19, 0 }
  0x92   : > { %2565 = dma.done.wait (%p3197_p2), [#allocation6], 16   ;;  %p3198_p6 = pmov %p3197_p2 }
  0x93   : > { %p3199_p1 = pmov %p3197_p2 }
  0x94   : > { %2567 = vsyncadd (%p3198_p6), [#allocation6], 4294967280 }
  0x95   : > { %2569 = dma.done.wait (%p3199_p1), [#allocation9], 272   ;;  %p3200_p3 = pmov %p3199_p1 }
  0x96   : > { %p3201_p13 = pmov %p3199_p1 }
  0x97   : > { %2571 = vsyncadd (%p3200_p3), [#allocation9], 4294967024 }
  0x98   : > { %2573 = dma.done.wait (%p3201_p13), [#allocation12], 272   ;;  %p3202_p4 = pmov %p3199_p1 }
  0x99   : > { %v2615_v0 = vmov 0.0   ;;  %vm2616_vm0 = vmmov 0   ;;  %v2274_v1 = vld [vmem:[%s3144_s4 + $0x8] sm:$0xff]   ;;  %v2276_v3 = vld [vmem:[%s3144_s4] sm:$0xff]   ;;  %vm642_vm1 = vcmask 261120   ;;  %vm814_vm2 = vcmask 64512  }
  0x9a   : > { %2575 = vsyncadd (%p3202_p4), [#allocation12], 4294967024  ;;  %2029 = vmatprep.subr.bf16.mxu1 %v2615_v0  ;;  %2021 = vmatprep.subr.bf16.mxu0 %v2615_v0  ;;  %v2275_v2 = vld [vmem:[%s3142_s2 + $0x8] sm:$0xff]   ;;  %v2277_v4 = vld [vmem:[%s3142_s2] sm:$0xff]   ;;  %s2617_s7 = smov 120   ;;  %vm864_vm3 = vcmask 130048  }
  0x9b   : > { %2033 = vmatprep.mubr.msk.bf16.mxu1 %vm2616_vm0, %v2615_v0  ;;  %2025 = vmatprep.mubr.msk.bf16.mxu0 %vm2616_vm0, %v2615_v0  ;;  %v615_v5 = vld [vmem:[%s540_s20] sm:$0xff]  ;;  %v616_v6 = vld [vmem:[%s540_s20 + $0x8] sm:$0xff]  ;;  %s2618_s26 = smov 112   ;;  %vm1066_vm4 = vcmask 1043456   ;;  %s2619_s14 = smov 104   ;;  %vm1686_vm5 = vcmask 523264  }
  0x9c   : > { %2030 = vmatpush3.bf16.msra.mxu1 %v2274_v1  ;;  %2022 = vmatpush3.bf16.msra.mxu0 %v2275_v2  ;;  %v2915_v7 = vld [vmem:[%s531_s29] sm:$0xff]  ;;  %v618_v8 = vpack.c.bf16 %v616_v6, %v615_v5  ;;  %v2919_v9 = vld [vmem:[%s531_s29 + $0x8] sm:$0xff]  ;;  %s3203_s3 = sld [smem:[#allocation23_spill]]  ;;  %s609_s10 = scalar_lea.vmem [#allocation14], %s2867_s8 }
  0x9d   : > { %2031 = vmatprep.subr.bf16.mxu1 %v2615_v0  ;;  %2023 = vmatprep.subr.bf16.mxu0 %v2615_v0  ;;  %v2923_v10 = vpack.c.bf16 %v2919_v9, %v2915_v7  ;;  %v1932_v12 = vld [vmem:[#allocation7] ss:$0 sm:$0xff]  ;;  %v2278_v15 = vld [vmem:[%s3145_s5 + $0x8] sm:$0xff]   ;;  %v1939_v38 = vld [vmem:[#allocation8] ss:$0 sm:$0xff]  ;;  %s1751_s29 = sshll.u32 %s609_s10, 4  ;;  %s3091_s29 = int_to_ptr.vmem [resolvable:$true] %s1751_s29 }
  0x9e   : > { %v2279_v19 = vld [vmem:[%s3145_s5] sm:$0xff]   ;;  %s3206_s20 = sld [smem:[#allocation36_spill]]  ;;  %s1736_s8 = scalar_lea.sflag [#allocation4], %s2864_s0 }
  0x9f   : > { %s2506_s13 = scalar_lea.vmem %s3091_s29, 256  ;;  %s2620_s19 = smov [#allocation14]  }
  0xa0   : > { %2032 = vmatpush3.bf16.msra.mxu1 %v2276_v3  ;;  %2024 = vmatpush3.bf16.msra.mxu0 %v2277_v4  ;;  %p2507_p5 = scmp.ne.s32.totalorder %s3091_s29, %s2506_s13  ;;  %s2510_s27 = sshll.u32 %s2620_s19, 4  ;;  %s2511_s27 = int_to_ptr.vmem [resolvable:$false] %s2510_s27 }
  0xa1   : > { %2045 = vmatprep.subr.bf16.mxu1 %v2615_v0  ;;  %2037 = vmatprep.subr.bf16.mxu0 %v2615_v0  ;;  %s2512_s16 = scalar_lea.vmem %s2511_s27, 512  ;;  %p2513_p10 = scmp.lt.s32.totalorder %s3091_s29, %s2511_s27 }
  0xa2   : > { %p2508_p7 = pnand %p2507_p5, %p2818_p12  ;;  %p2514_p9 = scmp.lt.s32.totalorder %s2512_s16, %s2506_s13 }
  0xa3   : > { %2034 = vmatmul.mubr.msk.bf16.vlgmr.msra.gmra.mxu1 %vm642_vm1, %v618_v8  ;;  %2026 = vmatmul.mubr.msk.bf16.vlgmr.msra.gmra.mxu0 %vm642_vm1, %v2923_v10 }
  0xa4   : > { %2047 = vmatprep.mubr.msk.bf16.mxu1 %vm2616_vm0, %v2615_v0  ;;  %2041 = vmatprep.mubr.msk.bf16.mxu0 %vm2616_vm0, %v2615_v0  ;;  %p2509_p8 = pneg %p2508_p7  ;;  %p2515_p11 = por %p2514_p9, %p2513_p10 }
  0xa5   : > { %2038 = vmatpush3.bf16.msra.mxu0 %v2278_v15 }
  0xa6   : > { %2039 = vmatprep.subr.bf16.mxu0 %v2615_v0  ;;  %p2516_p2 = pnand %p2515_p11, %p2509_p8 }
  0xa9   : > { %2040 = vmatpush3.bf16.msra.mxu0 %v2279_v19  ;;  %v933_v19 = vld [vmem:[#allocation10] sm:$0xf] }
  0xaa   : > { %2051 = vmatprep.subr.bf16.mxu0 %v2615_v0 }
  0xac   : > { %2042 = vmatmul.mubr.msk.bf16.vlgmr.msra.gmra.mxu0 %vm642_vm1, %v618_v8 }
  0xad   : > { %2053 = vmatprep.mubr.msk.bf16.mxu0 %vm2616_vm0, %v2615_v0 }
 0x163   : > { %v740_v11 = vpop.f32.mrf.mxu1  ;;  %v680_v13 = vpop.f32.mrf.mxu0 }
 0x164   : > { %v681_v17 = vadd.f32 %v1932_v12, %v680_v13 }
 0x165   : > { %v2035_v14 = vpop.f32.mrf.mxu1  ;;  %v2027_v16 = vpop.f32.mrf.mxu0 }
 0x167   : > { %v743_v18 = vpop.f32.mrf.mxu1  ;;  %v683_v21 = vpop.f32.mrf.mxu0 }
 0x168   : > { %v2940_v20 = vpack.c.bf16 %v743_v18, %v740_v11  ;;  %v684_v22 = vadd.f32 %v1932_v12, %v683_v21  ;;  %v1115_v21 = vsel %vm1066_vm4, %v933_v19, 0 }
 0x169   : > { %v2036_v23 = vpop.f32.mrf.mxu1  ;;  %v2028_v24 = vpop.f32.mrf.mxu0 }
 0x16a   : > { %938 = vrot.lane.b32.xlu0 %v2940_v20, %s2617_s7  ;;  %v819_v25 = vsel %vm814_vm2, %v2940_v20, 0  ;;  %v2947_v26 = vpack.c.bf16 %v684_v22, %v681_v17  ;;  %v1062_v17 = vld [vmem:[#allocation10 + $0x4] sm:$0xf] }
 0x16b   : > { %2046 = vmatpush3.bf16.xpose.msra.mxu1 %v819_v25  ;;  %v1068_v18 = vsel %vm1066_vm4, %v1062_v17, 0 }
 0x16c   : > { %2057 = vmatprep.subr.bf16.mxu1 %v2615_v0  ;;  %v804_v39 = vpop.f32.mrf.mxu0 }
 0x16d   : > { %v805_v41 = vadd.f32 %v1939_v38, %v804_v39 }
 0x16e   : > { %935 = vrot.lane.b32.xlu0 %v2947_v26, %s2617_s7  ;;  %v2043_v40 = vpop.f32.mrf.mxu0 }
 0x170   : > { %v807_v42 = vpop.f32.mrf.mxu0 }
 0x171   : > { %v808_v43 = vadd.f32 %v1939_v38, %v807_v42 }
 0x172   : > { %2048 = vmatmul.mubr.msk.bf16.vlgmr.msra.gmra.mxu1 %vm814_vm2, %v2947_v26  ;;  %v2044_v44 = vpop.f32.mrf.mxu0 }
 0x173   : > { %2059 = vmatprep.mubr.msk.bf16.mxu1 %vm2616_vm0, %v2615_v0  ;;  %v2967_v45 = vpack.c.bf16 %v808_v43, %v805_v41 }
 0x175   : > { %2052 = vmatpush3.bf16.msra.mxu0 %v2967_v45 }
 0x176   : > { %2063 = vmatprep.subr.bf16.mxu0 %v2615_v0 }
 0x1dc   : > { %v939_v27 = vpop.permute.xlu0 %938 }
 0x1dd   : > { %v944_v28 = vsel %vm814_vm2, %v939_v27, 0 }
 0x1de   : > { %2058 = vmatpush3.bf16.xpose.msra.mxu1 %v944_v28 }
 0x1df   : > { %2069 = vmatprep.subr.bf16.mxu1 %v2615_v0 }
 0x1e0   : > { %v936_v29 = vpop.permute.xlu0 %935 }
 0x1e5   : > { %2060 = vmatmul.mubr.msk.bf16.vlgmr.msra.gmra.mxu1 %vm814_vm2, %v936_v29 }
 0x1e6   : > { %2071 = vmatprep.mubr.msk.bf16.mxu1 %vm2616_vm0, %v2615_v0  ;;  %2070 = vmatpush3.bf16.msra.mxu1 %v1068_v18 }
 0x1e7   : > { %2081 = vmatprep.subr.bf16.mxu1 %v2615_v0 }
 0x232   : > { %v855_v30 = vpop.f32.mrf.mxu1 }
 0x233   : > { %v862_v31 = vmul.f32 0.35355338, %v855_v30 }
 0x234   : > { %v2049_v32 = vpop.f32.mrf.mxu1 }
 0x235   : > { %v865_v33 = vsel %vm864_vm3, %v862_v31, -inf }
 0x236   : > { %866 = vmax.xlane.f32.xlu1 %v865_v33  ;;  %v858_v34 = vpop.f32.mrf.mxu1 }
 0x237   : > { %v863_v35 = vmul.f32 0.35355338, %v858_v34 }
 0x238   : > { %v2050_v36 = vpop.f32.mrf.mxu1 }
 0x239   : > { %v868_v37 = vsel %vm864_vm3, %v863_v35, -inf }
 0x23a   : > { %869 = vmax.xlane.f32.xlu1 %v868_v37 }
 0x2a5   : > { %v980_v46 = vpop.f32.mrf.mxu1 }
 0x2a6   : > { %v987_v47 = vmul.f32 0.35355338, %v980_v46 }
 0x2a7   : > { %v2061_v48 = vpop.f32.mrf.mxu1 }
 0x2a8   : > { %v989_v49 = vsel %vm864_vm3, %v987_v47, -inf }
 0x2a9   : > { %990 = vmax.xlane.f32.xlu0 %v989_v49  ;;  %v983_v50 = vpop.f32.mrf.mxu1 }
 0x2aa   : > { %v988_v51 = vmul.f32 0.35355338, %v983_v50 }
 0x2ab   : > { %v2062_v52 = vpop.f32.mrf.mxu1 }
 0x2ac   : > { %v992_v53 = vsel %vm864_vm3, %v988_v51, -inf }
 0x2ad   : > { %993 = vmax.xlane.f32.xlu1 %v992_v53 }
 0x2be   : > { %1009 = vrot.lane.b32.xlu1 %v2967_v45, %s2617_s7  ;;  %s3204_s7 = sld [smem:[#allocation35_spill]] }
 0x2bf   : > { %v867_v54 = vpop.xlane.xlu1 %866 }
 0x2c0   : > { %v871_v55 = vsub.f32 %v862_v31, %v867_v54 }
 0x2c2   : > { %v873_v56 = vmul.f32 1.442695, %v871_v55 }
 0x2c3   : > { %v870_v57 = vpop.xlane.xlu1 %869 }
 0x2c4   : > { %v872_v58 = vsub.f32 %v863_v35, %v870_v57  ;;  %2288 = vpow2.f32 %v873_v56 }
 0x2c6   : > { %v875_v59 = vmul.f32 1.442695, %v872_v58 }
 0x2c8   : > { %2290 = vpow2.f32 %v875_v59 }
 0x2d1   : > { %v2289_v60 = vpop.eup %2288 }
 0x2d2   : > { %v877_v14 = vsel %vm864_vm3, %v2289_v60, 0.0 }
 0x2d5   : > { %v2291_v61 = vpop.eup %2290 }
 0x2d6   : > { %v883_v62 = vpack.c.bf16 %v2291_v61, %v2289_v60  ;;  %v880_v16 = vsel %vm864_vm3, %v2291_v61, 0.0 }
 0x2d8   : > { %2054 = vmatmul.mubr.msk.bf16.vlgmr.msra.gmra.mxu0 %vm864_vm3, %v883_v62 }
 0x2d9   : > { %2065 = vmatprep.mubr.msk.bf16.mxu0 %vm2616_vm0, %v2615_v0 }
 0x332   : > { %v991_v63 = vpop.xlane.xlu0 %990 }
 0x333   : > { %v995_v1 = vsub.f32 %v987_v47, %v991_v63 }
 0x335   : > { %v997_v2 = vmul.f32 1.442695, %v995_v1 }
 0x336   : > { %v994_v3 = vpop.xlane.xlu1 %993 }
 0x337   : > { %2292 = vpow2.f32 %v997_v2  ;;  %v996_v4 = vsub.f32 %v988_v51, %v994_v3 }
 0x339   : > { %v999_v5 = vmul.f32 1.442695, %v996_v4 }
 0x33a   : > { %v1010_v6 = vpop.permute.xlu1 %1009 }
 0x33b   : > { %2294 = vpow2.f32 %v999_v5  ;;  %2064 = vmatpush3.bf16.msra.mxu0 %v1010_v6 }
 0x33c   : > { %2075 = vmatprep.subr.bf16.mxu0 %v2615_v0 }
 0x344   : > { %v2293_v8 = vpop.eup %2292 }
 0x345   : > { %v1001_v11 = vsel %vm864_vm3, %v2293_v8, 0.0 }
 0x346   : > { %1002 = vadd.xlane.f32.xlu1 %v1001_v11 }
 0x348   : > { %v2295_v12 = vpop.eup %2294 }
 0x349   : > { %v1004_v13 = vsel %vm864_vm3, %v2295_v12, 0.0  ;;  %v1007_v15 = vpack.c.bf16 %v2295_v12, %v2293_v8 }
 0x34a   : > { %1005 = vadd.xlane.f32.xlu0 %v1004_v13  ;;  %878 = vadd.xlane.f32.xlu1 %v877_v14 }
 0x34b   : > { %2066 = vmatmul.mubr.msk.bf16.vlgmr.msra.gmra.mxu0 %vm864_vm3, %v1007_v15 }
 0x34c   : > { %2077 = vmatprep.mubr.msk.bf16.mxu0 %vm2616_vm0, %v2615_v0  ;;  %2076 = vmatpush3.bf16.msra.mxu0 %v1115_v21  ;;  %v1283_v21 = vld [vmem:[#allocation10 + $0x8] sm:$0xf] }
 0x34d   : > { %2087 = vmatprep.subr.bf16.mxu0 %v2615_v0 }
 0x35b   : > { %1230 = vrot.lane.b32.xlu1 %v2967_v45, %s2618_s26 }
 0x360   : > { %1160 = vrot.lane.b32.xlu0 %v2940_v20, %s2618_s26 }
 0x364   : > { %1158 = vrot.lane.b32.xlu0 %v2947_v26, %s2618_s26 }
 0x383   : > { %881 = vadd.xlane.f32.xlu0 %v880_v16 }
 0x398   : > { %v921_v22 = vpop.f32.mrf.mxu0 }
 0x39a   : > { %v2055_v23 = vpop.f32.mrf.mxu0 }
 0x39c   : > { %v924_v24 = vpop.f32.mrf.mxu0 }
 0x39e   : > { %v2056_v25 = vpop.f32.mrf.mxu0 }
 0x3cf   : > { %v1003_v28 = vpop.xlane.xlu1 %1002 }
 0x3d0   : > { %2296 = vrcp.f32 %v1003_v28 }
 0x3d3   : > { %v1006_v27 = vpop.xlane.xlu0 %1005  ;;  %v879_v30 = vpop.xlane.xlu1 %878 }
 0x3d4   : > { %2298 = vrcp.f32 %v1006_v27 }
 0x3d5   : > { %2300 = vrcp.f32 %v879_v30 }
 0x3d7   : > { %v1161_v29 = vpop.permute.xlu0 %1160  ;;  %v1231_v49 = vpop.permute.xlu1 %1230 }
 0x3d8   : > { %v1166_v42 = vsel %vm814_vm2, %v1161_v29, 0 }
 0x3db   : > { %v1159_v31 = vpop.permute.xlu0 %1158 }
 0x3dd   : > { %v2297_v35 = vpop.eup %2296 }
 0x3e1   : > { %v2299_v36 = vpop.eup %2298 }
 0x3e2   : > { %v2301_v43 = vpop.eup %2300 }
 0x3e3   : > { %v930_v46 = vmul.f32 %v2301_v43, %v921_v22  ;;  %v1288_v22 = vsel %vm1066_vm4, %v1283_v21, 0 }
 0x40b   : > { %v1049_v32 = vpop.f32.mrf.mxu0 }
 0x40c   : > { %v882_v33 = vpop.xlane.xlu0 %881  ;;  %v1058_v38 = vmul.f32 %v2297_v35, %v1049_v32 }
 0x40d   : > { %2302 = vrcp.f32 %v882_v33  ;;  %v2067_v34 = vpop.f32.mrf.mxu0 }
 0x40f   : > { %v1052_v37 = vpop.f32.mrf.mxu0 }
 0x410   : > { %v1059_v39 = vmul.f32 %v2299_v36, %v1052_v37 }
 0x411   : > { %v2068_v40 = vpop.f32.mrf.mxu0 }
 0x412   : > { %v1060_v41 = vpack.c.bf16 %v1059_v39, %v1058_v38 }
 0x414   : > { %2072 = vmatmul.mubr.msk.bf16.vlgmr.msra.gmra.mxu1 %vm814_vm2, %v1060_v41 }
 0x415   : > { %2082 = vmatpush3.bf16.xpose.msra.mxu1 %v1166_v42  ;;  %2083 = vmatprep.mubr.msk.bf16.mxu1 %vm2616_vm0, %v2615_v0 }
 0x416   : > { %2093 = vmatprep.subr.bf16.mxu1 %v2615_v0 }
 0x41a   : > { %v2303_v44 = vpop.eup %2302 }
 0x41b   : > { %v931_v47 = vmul.f32 %v2303_v44, %v924_v24 }
 0x41c   : > { %2084 = vmatmul.mubr.msk.bf16.vlgmr.msra.gmra.mxu1 %vm814_vm2, %v1159_v31 }
 0x41d   : > { %v932_v48 = vpack.c.bf16 %v931_v47, %v930_v46  ;;  %2095 = vmatprep.mubr.msk.bf16.mxu1 %vm2616_vm0, %v2615_v0  ;;  %2094 = vmatpush3.bf16.msra.mxu1 %v1288_v22 }
 0x41e   : > { %2105 = vmatprep.subr.bf16.mxu1 %v2615_v0 }
 0x41f   : > { %2078 = vmatmul.mubr.msk.bf16.vlgmr.msra.gmra.mxu0 %vm814_vm2, %v932_v48 }
 0x420   : > { %2088 = vmatpush3.bf16.msra.mxu0 %v1231_v49  ;;  %2089 = vmatprep.mubr.msk.bf16.mxu0 %vm2616_vm0, %v2615_v0 }
 0x421   : > { %2099 = vmatprep.subr.bf16.mxu0 %v2615_v0 }
 0x4d4   : > { %v1104_v50 = vpop.f32.mrf.mxu1 }
 0x4d6   : > { %v2073_v51 = vpop.f32.mrf.mxu1 }
 0x4d8   : > { %v1107_v52 = vpop.f32.mrf.mxu1 }
 0x4da   : > { %v2074_v53 = vpop.f32.mrf.mxu1 }
 0x4dc   : > { %v1202_v54 = vpop.f32.mrf.mxu1 }
 0x4dd   : > { %v1209_v55 = vmul.f32 0.35355338, %v1202_v54 }
 0x4de   : > { %v2085_v56 = vpop.f32.mrf.mxu1 }
 0x4df   : > { %v1151_v57 = vpop.f32.mrf.mxu0  ;;  %v1211_v58 = vsel %vm864_vm3, %v1209_v55, -inf }
 0x4e0   : > { %v3006_v59 = vadd.f32 %v1151_v57, %v1104_v50  ;;  %1212 = vmax.xlane.f32.xlu1 %v1211_v58  ;;  %v1205_v60 = vpop.f32.mrf.mxu1 }
 0x4e1   : > { %v1210_v61 = vmul.f32 0.35355338, %v1205_v60  ;;  %v2079_v62 = vpop.f32.mrf.mxu0 }
 0x4e2   : > { %v2086_v63 = vpop.f32.mrf.mxu1  ;;  %v1458_v62 = vld [vmem:[#allocation10 + $0xc] sm:$0xf] }
 0x4e3   : > { %v1154_v1 = vpop.f32.mrf.mxu0  ;;  %v1214_v2 = vsel %vm864_vm3, %v1210_v61, -inf  ;;  %v1463_v63 = vsel %vm1066_vm4, %v1458_v62, 0 }
 0x4e4   : > { %v3009_v3 = vadd.f32 %v1154_v1, %v1107_v52  ;;  %1215 = vmax.xlane.f32.xlu1 %v1214_v2 }
 0x4e5   : > { %v2080_v4 = vpop.f32.mrf.mxu0 }
 0x4f5   : > { %1335 = vrot.lane.b32.xlu1 %v2940_v20, %s2619_s14 }
 0x4f9   : > { %1333 = vrot.lane.b32.xlu1 %v2947_v26, %s2619_s14 }
 0x569   : > { %v1213_v5 = vpop.xlane.xlu1 %1212 }
 0x56a   : > { %v1217_v6 = vsub.f32 %v1209_v55, %v1213_v5 }
 0x56c   : > { %v1219_v8 = vmul.f32 1.442695, %v1217_v6 }
 0x56d   : > { %v1216_v11 = vpop.xlane.xlu1 %1215 }
 0x56e   : > { %2304 = vpow2.f32 %v1219_v8  ;;  %v1218_v12 = vsub.f32 %v1210_v61, %v1216_v11 }
 0x570   : > { %v1221_v13 = vmul.f32 1.442695, %v1218_v12 }
 0x571   : > { %v1336_v17 = vpop.permute.xlu1 %1335 }
 0x572   : > { %2306 = vpow2.f32 %v1221_v13  ;;  %v1341_v26 = vsel %vm814_vm2, %v1336_v17, 0  ;;  %v2283_v17 = vld [vmem:[#allocation13] sm:$0xff]  }
 0x575   : > { %v1334_v19 = vpop.permute.xlu1 %1333 }
 0x57b   : > { %v2305_v14 = vpop.eup %2304 }
 0x57c   : > { %v1223_v15 = vsel %vm864_vm3, %v2305_v14, 0.0 }
 0x57d   : > { %1224 = vadd.xlane.f32.xlu0 %v1223_v15  ;;  %v2281_v15 = vld [vmem:[%s3149_s9] sm:$0xff]  }
 0x57f   : > { %v2307_v16 = vpop.eup %2306 }
 0x580   : > { %v1226_v18 = vsel %vm864_vm3, %v2307_v16, 0.0  ;;  %v1229_v20 = vpack.c.bf16 %v2307_v16, %v2305_v14  ;;  %v2282_v16 = vld [vmem:[#allocation13 + $0x8] sm:$0xff]  }
 0x581   : > { %1227 = vadd.xlane.f32.xlu1 %v1226_v18 }
 0x582   : > { %2090 = vmatmul.mubr.msk.bf16.vlgmr.msra.gmra.mxu0 %vm864_vm3, %v1229_v20 }
 0x583   : > { %2100 = vmatpush3.bf16.xpose.msra.mxu0 %v1341_v26  ;;  %2101 = vmatprep.mubr.msk.bf16.mxu0 %vm2616_vm0, %v2615_v0 }
 0x584   : > { %2111 = vmatprep.subr.bf16.mxu0 %v2615_v0 }
 0x58a   : > { %2102 = vmatmul.mubr.msk.bf16.vlgmr.msra.gmra.mxu0 %vm814_vm2, %v1334_v19  ;;  %v1955_v19 = vld [vmem:[#allocation11] ss:$0 sm:$0xff] }
 0x58b   : > { %2113 = vmatprep.mubr.msk.bf16.mxu0 %vm2616_vm0, %v2615_v0  ;;  %2112 = vmatpush3.bf16.msra.mxu0 %v1463_v63 }
 0x58c   : > { %2125 = vmatprep.subr.bf16.mxu0 %v2615_v0 }
 0x606   : > { %v1225_v23 = vpop.xlane.xlu0 %1224 }
 0x607   : > { %2308 = vrcp.f32 %v1225_v23 }
 0x60a   : > { %v1228_v24 = vpop.xlane.xlu1 %1227 }
 0x60b   : > { %2310 = vrcp.f32 %v1228_v24 }
 0x614   : > { %v2309_v28 = vpop.eup %2308 }
 0x618   : > { %v2311_v29 = vpop.eup %2310 }
 0x642   : > { %v1270_v25 = vpop.f32.mrf.mxu0 }
 0x643   : > { %v1279_v31 = vmul.f32 %v2309_v28, %v1270_v25 }
 0x644   : > { %v2091_v27 = vpop.f32.mrf.mxu0 }
 0x645   : > { %v2284_v27 = vld [vmem:[%s3152_s12 + $0x18] sm:$0xff]  }
 0x646   : > { %v1273_v30 = vpop.f32.mrf.mxu0 }
 0x647   : > { %v1280_v32 = vmul.f32 %v2311_v29, %v1273_v30 }
 0x648   : > { %v2092_v33 = vpop.f32.mrf.mxu0 }
 0x649   : > { %v1281_v34 = vpack.c.bf16 %v1280_v32, %v1279_v31  ;;  %v2285_v32 = vld [vmem:[%s3152_s12 + $0x10] sm:$0xff]   ;;  %v2286_v33 = vld [vmem:[%s3152_s12 + $0x8] sm:$0xff]  }
 0x64a   : > { %v1377_v35 = vpop.f32.mrf.mxu0 }
 0x64b   : > { %v1384_v36 = vmul.f32 0.35355338, %v1377_v35  ;;  %2096 = vmatmul.mubr.msk.bf16.vlgmr.msra.gmra.mxu1 %vm814_vm2, %v1281_v34  ;;  %v2287_v34 = vld [vmem:[%s3152_s12] sm:$0xff]  }
 0x64c   : > { %v2103_v37 = vpop.f32.mrf.mxu0  ;;  %2107 = vmatprep.mubr.msk.bf16.mxu1 %vm2616_vm0, %v2615_v0 }
 0x64d   : > { %v1386_v38 = vsel %vm864_vm3, %v1384_v36, -inf  ;;  %v1962_v37 = vld [vmem:[%s3151_s11] ss:$0 sm:$0xff] }
 0x64e   : > { %1387 = vmax.xlane.f32.xlu0 %v1386_v38  ;;  %v1380_v39 = vpop.f32.mrf.mxu0 }
 0x64f   : > { %v1385_v40 = vmul.f32 0.35355338, %v1380_v39 }
 0x650   : > { %v2104_v41 = vpop.f32.mrf.mxu0 }
 0x651   : > { %v1389_v42 = vsel %vm864_vm3, %v1385_v40, -inf }
 0x652   : > { %1390 = vmax.xlane.f32.xlu0 %v1389_v42 }
 0x668   : > { %1405 = vrot.lane.b32.xlu0 %v2967_v45, %s2619_s14  ;;  %s1976_s14 = sshll.u32 %s3203_s3, 8 }
 0x669   : > { %s3089_s23 = scalar_lea.hbm %s3206_s20, %s1976_s14 }
 0x6d7   : > { %v1388_v43 = vpop.xlane.xlu0 %1387 }
 0x6d8   : > { %v1392_v44 = vsub.f32 %v1384_v36, %v1388_v43 }
 0x6da   : > { %v1394_v46 = vmul.f32 1.442695, %v1392_v44 }
 0x6db   : > { %v1391_v47 = vpop.xlane.xlu0 %1390 }
 0x6dc   : > { %2312 = vpow2.f32 %v1394_v46  ;;  %v1393_v48 = vsub.f32 %v1385_v40, %v1391_v47  ;;  %v1963_v47 = vld [vmem:[%s3204_s7] ss:$0 sm:$0xff] }
 0x6de   : > { %v1396_v49 = vmul.f32 1.442695, %v1393_v48 }
 0x6df   : > { %v1406_v50 = vpop.permute.xlu0 %1405 }
 0x6e0   : > { %2314 = vpow2.f32 %v1396_v49  ;;  %2106 = vmatpush3.bf16.msra.mxu1 %v1406_v50 }
 0x6e1   : > { %2117 = vmatprep.subr.bf16.mxu1 %v2615_v0 }
 0x6e9   : > { %v2313_v51 = vpop.eup %2312 }
 0x6ea   : > { %v1398_v52 = vsel %vm864_vm3, %v2313_v51, 0.0 }
 0x6eb   : > { %1399 = vadd.xlane.f32.xlu0 %v1398_v52 }
 0x6ed   : > { %v2315_v53 = vpop.eup %2314 }
 0x6ee   : > { %v1401_v54 = vsel %vm864_vm3, %v2315_v53, 0.0  ;;  %v1404_v45 = vpack.c.bf16 %v2315_v53, %v2313_v51 }
 0x6ef   : > { %1402 = vadd.xlane.f32.xlu1 %v1401_v54 }
 0x6f0   : > { %2108 = vmatmul.mubr.msk.bf16.vlgmr.msra.gmra.mxu1 %vm864_vm3, %v1404_v45 }
 0x6f1   : > { %2121 = vmatprep.mubr.msk.bf16.mxu1 %vm2616_vm0, %v2615_v0  ;;  %2118 = vmatpush3.bf16.msra.mxu1 %v2282_v16 }
 0x6f2   : > { %2119 = vmatprep.subr.bf16.mxu1 %v2615_v0 }
 0x6f5   : > { %2120 = vmatpush3.bf16.msra.mxu1 %v2283_v17 }
 0x6f6   : > { %2133 = vmatprep.subr.bf16.mxu1 %v2615_v0 }
 0x70b   : > { %v1324_v55 = vpop.f32.mrf.mxu1 }
 0x70c   : > { %v1331_v56 = vadd.f32 %v1324_v55, %v3006_v59 }
 0x70d   : > { %v2097_v57 = vpop.f32.mrf.mxu1 }
 0x70f   : > { %v1327_v58 = vpop.f32.mrf.mxu1 }
 0x710   : > { %v1332_v60 = vadd.f32 %v1327_v58, %v3009_v3  ;;  %v2280_v3 = vld [vmem:[%s3149_s9 + $0x8] sm:$0xff]  }
 0x711   : > { %v2098_v61 = vpop.f32.mrf.mxu1 }
 0x774   : > { %v1400_v1 = vpop.xlane.xlu0 %1399 }
 0x775   : > { %2316 = vrcp.f32 %v1400_v1 }
 0x778   : > { %v1403_v2 = vpop.xlane.xlu1 %1402 }
 0x779   : > { %2318 = vrcp.f32 %v1403_v2 }
 0x782   : > { %v2317_v6 = vpop.eup %2316 }
 0x786   : > { %v2319_v8 = vpop.eup %2318 }
 0x7b0   : > { %v1445_v4 = vpop.f32.mrf.mxu1 }
 0x7b1   : > { %v1454_v11 = vmul.f32 %v2317_v6, %v1445_v4 }
 0x7b2   : > { %v2109_v5 = vpop.f32.mrf.mxu1 }
 0x7b4   : > { %v1448_v59 = vpop.f32.mrf.mxu1 }
 0x7b5   : > { %v1455_v12 = vmul.f32 %v2319_v8, %v1448_v59 }
 0x7b6   : > { %v2110_v13 = vpop.f32.mrf.mxu1 }
 0x7b7   : > { %v1456_v14 = vpack.c.bf16 %v1455_v12, %v1454_v11 }
 0x7b9   : > { %2114 = vmatmul.mubr.msk.bf16.vlgmr.msra.gmra.mxu0 %vm814_vm2, %v1456_v14 }
 0x7ba   : > { %2126 = vmatpush3.bf16.msra.mxu0 %v2280_v3  ;;  %2129 = vmatprep.mubr.msk.bf16.mxu0 %vm2616_vm0, %v2615_v0 }
 0x7bb   : > { %2127 = vmatprep.subr.bf16.mxu0 %v2615_v0 }
 0x7be   : > { %2128 = vmatpush3.bf16.msra.mxu0 %v2281_v15 }
 0x7c1   : > { %2130 = vmatmul.mubr.msk.bf16.vlgmr.msra.gmra.mxu0 %vm642_vm1, %v2923_v10 }
 0x879   : > { %v1499_v18 = vpop.f32.mrf.mxu0 }
 0x87a   : > { %v1506_v26 = vadd.f32 %v1499_v18, %v1331_v56 }
 0x87b   : > { %v2115_v20 = vpop.f32.mrf.mxu0 }
 0x87c   : > { %v1515_v24 = vadd.f32 %v1955_v19, %v1506_v26 }
 0x87d   : > { %v1502_v21 = vpop.f32.mrf.mxu0 }
 0x87e   : > { %v1507_v22 = vadd.f32 %v1502_v21, %v1332_v60 }
 0x87f   : > { %v2116_v23 = vpop.f32.mrf.mxu0 }
 0x880   : > { %v1516_v25 = vadd.f32 %v1955_v19, %v1507_v22 }
 0x881   : > { %v1628_v28 = vpop.f32.mrf.mxu0 }
 0x882   : > { %v1521_v10 = vpack.c.bf16 %v1516_v25, %v1515_v24 }
 0x883   : > { %v2131_v29 = vpop.f32.mrf.mxu0 }
 0x884   : > { %2122 = vmatmul.mubr.msk.bf16.vlgmr.msra.gmra.mxu1 %vm642_vm1, %v1521_v10 }
 0x885   : > { %2134 = vmatpush3.bf16.msra.mxu1 %v2284_v27  ;;  %2141 = vmatprep.mubr.msk.bf16.mxu1 %vm2616_vm0, %v2615_v0  ;;  %v1631_v30 = vpop.f32.mrf.mxu0 }
 0x886   : > { %2135 = vmatprep.subr.bf16.mxu1 %v2615_v0 }
 0x887   : > { %v2132_v31 = vpop.f32.mrf.mxu0 }
 0x889   : > { %2136 = vmatpush3.bf16.msra.mxu1 %v2285_v32 }
 0x88a   : > { %2137 = vmatprep.subr.bf16.mxu1 %v2615_v0 }
 0x88d   : > { %2138 = vmatpush3.bf16.msra.mxu1 %v2286_v33 }
 0x88e   : > { %2139 = vmatprep.subr.bf16.mxu1 %v2615_v0 }
 0x891   : > { %2140 = vmatpush3.bf16.msra.mxu1 %v2287_v34 }
 0x944   : > { %v1575_v35 = vpop.f32.mrf.mxu1 }
 0x945   : > { %v1629_v36 = vadd.f32 %v1628_v28, %v1575_v35 }
 0x946   : > { %v2123_v38 = vpop.f32.mrf.mxu1 }
 0x947   : > { %v1642_v40 = vadd.f32 %v1962_v37, %v1629_v36 }
 0x948   : > { %v1578_v39 = vpop.f32.mrf.mxu1 }
 0x949   : > { %v1632_v41 = vadd.f32 %v1631_v30, %v1578_v39  ;;  %v1644_v0 = vmax.f32 %v1642_v40, 0.0 }
 0x94a   : > { %v2124_v42 = vpop.f32.mrf.mxu1 }
 0x94b   : > { %v1643_v43 = vadd.f32 %v1962_v37, %v1632_v41 }
 0x94d   : > { %v1645_v44 = vmax.f32 %v1643_v43, 0.0 }
 0x94f   : > { %v1646_v46 = vpack.c.bf16 %v1645_v44, %v1644_v0 }
 0x951   : > { %2142 = vmatmul.mubr.msk.bf16.vlgmr.msra.gmra.mxu1 %vm1686_vm5, %v1646_v46 }
 0xa11   : > { %v1724_v48 = vpop.f32.mrf.mxu1 }
 0xa12   : > { %v1725_v49 = vadd.f32 %v1963_v47, %v1724_v48 }
 0xa13   : > { %v2143_v50 = vpop.f32.mrf.mxu1 }
 0xa14   : > { %v1731_v51 = vadd.f32 %v1725_v49, %v2915_v7 }
 0xa15   : > { %v1727_v52 = vpop.f32.mrf.mxu1 }
 0xa16   : > { %1733 = vst.msk [vmem:[%s609_s10] sm:$0xff] %vm642_vm1, %v1731_v51  ;;  %v1728_v53 = vadd.f32 %v1963_v47, %v1727_v52 }
 0xa17   : > { %v2144_v54 = vpop.f32.mrf.mxu1 }
 0xa18   : > { %v1732_v7 = vadd.f32 %v1728_v53, %v2919_v9 }
 0xa1a   : > { %1734 = vst.msk [vmem:[%s609_s10 + $0x8] sm:$0xff] %vm642_vm1, %v1732_v7 }
 0xa1b   : > { %2519 = shalt.err (!%p2516_p2)
}
 0xa1c   : > { %s2520_s24 = scalar_lea.hbm %s3089_s23, 256  ;;  %s2524_s25 = scalar_lea.hbm %s3206_s20, 1024 }
 0xa1d   : > { %p2521_p6 = scmp.ne.s32.totalorder %s3089_s23, %s2520_s24  ;;  %p2525_p13 = scmp.lt.s32.totalorder %s3089_s23, %s3206_s20 }
 0xa1e   : > { %p2526_p4 = scmp.lt.s32.totalorder %s2524_s25, %s2520_s24 }
 0xa1f   : > { %p2522_p1 = pnand %p2521_p6, %p2818_p12 }
 0xa20   : > { %p2527_p5 = por %p2526_p4, %p2525_p13 }
 0xa21   : > { %p2523_p3 = pneg %p2522_p1 }
 0xa23   : > { %p2528_p7 = pnand %p2527_p5, %p2523_p3 }
 0xa25   : > { %2531 = shalt.err (!%p2528_p7)
}
 0xa26   : > { %s2621_s6 = smov 128   ;;  %s2622_s7 = smov 8  }
 0xa27   : > { %2169 = dma.vmem_to_hbm [thread:$0]  (%p2818_p12), %s3091_s29, 256, %s3089_s23, %s1736_s8, %s2621_s6, %s2621_s6, %s2622_s7  }
 0xa28 PF: > { %s3207_s14 = sld [smem:[#allocation21_spill]]  ;;  %p2209_p8 = scmp.ge.s32.totalorder %s2602_s18, 2 }
 0xa2a   : > { %p2195_p10 = pnand %p2209_p8, %p2826_p0 }
 0xa2c   : > { %p2196_p9 = pneg %p2195_p10 }
 0xa2e   : > { %s1766_s15 = sand.u32 1, %s3207_s14  }
 0xa2f   : > { %s1767_s17 = scalar_lea.sflag [#allocation4], %s1766_s15 }
 0xa30   : > { %2577 = dma.done.wait (%p2196_p9), %s1767_s17, 256  }
 0xa31   : > { %2579 = vsyncadd (%p2196_p9), %s1767_s17, 4294967040  ;;  %s35_s18 = sadd.s32 1, %s2602_s18   ;;  %s3209_s13 = sld [smem:[#allocation22_spill]] }
 0xa32   : > { %p32_p11 = scmp.ge.s32.totalorder %s35_s18, 6   ;;  %s3210_s15 = sld [smem:[#allocation27_spill]] }
 0xa33   : > { %s3211_s16 = sld [smem:[#allocation24_spill]]  ;;  %s3213_s29 = smov %s2586_s30 }
 0xa34   : > { %s3212_s17 = sld [smem:[#allocation25_spill]]  ;;  %34 = sbr.rel (!%p32_p11) target bundleno = 19 (0x13), region = 157 }
 0xa37   : > { %s3214_s30 = smov %s3209_s13 }
 0xa39   :  { %1772 = vsyncpa [#allocation3], 1 }
 0xa3a   :  { %1774 = vsyncpa [#allocation3 + $0x1], 1 }
 0xa3b   :  { %1775 = vsyncpa [#allocation6], 1 }
 0xa3c   :  { %1777 = vsyncpa [#allocation6 + $0x1], 1 }
 0xa3d   :  { %1778 = vsyncpa [#allocation9], 1 }
 0xa3e   :  { %1779 = vsyncpa [#allocation12], 1 }
 0xa3f   :  { %1780 = vsyncpa [#allocation4], 1 }
 0xa40   :  { %1782 = vsyncpa [#allocation4 + $0x1], 1 }

</bundles_post_ra>
